<compile_context>
chip_gen: v7x
topology: tpu7x:2x2x1
jax: 0.10.0
libtpu: 0.0.40
codegen_flags: <defaults>
</compile_context>

<pallas_src>
import jax
import jax.numpy as jnp
from jax import lax
from jax.experimental import pallas as pl
from jax.experimental.pallas import tpu as pltpu

INPUT_SIZE = 1
HIDDEN = 32           # hidden_size
OUTPUT = 1            # output_size
FC_HIDDEN = HIDDEN // 2
SUBLANE = 8

H = HIDDEN
F = FC_HIDDEN
O = OUTPUT

# ---- packed parameter slab layout: (SLAB_ROWS, 8H) f32, ONE HBM->VMEM DMA --
ROW_WFUSED = 0                 # 2H rows : fused per-step matmul RHS (2H, 8H)
ROW_WPRE   = 2 * H             # 3 rows  : [W_ih0_r|0], [W_ih0_z|0], [W_ih0_n|0]
ROW_BPRE   = 2 * H + 3         # 3 rows  : combined ih(+hh for r/z) biases, both layers
ROW_BHN    = 2 * H + 6         # 1 row   : [b_hh0_n | b_hh1_n]
ROW_FC1B   = 2 * H + 7         # 1 row   : fc1 bias      (cols 0:F)
ROW_FC1W   = 2 * H + 8         # H rows  : fc1 weight    (H, F)   -- row 72, 8-aligned
ROW_FC2W   = ROW_FC1W + H      # F rows  : fc2 weight    (F, O)   -- row 104, 8-aligned
ROW_FC2B   = ROW_FC2W + F      # 1 row   : fc2 bias
SLAB_ROWS  = ROW_FC2B + 1      # 121
SLAB_COLS  = 8 * H             # 256


def gru_model_kernel(x_ref, slab_ref, out_ref, pre_ref):
    """Two stacked GRU layers + FC head, wavefront-fused recurrence.

    Wave s uses carry h01 = [h0(s-1) | h1(s-2)] and produces [h0(s) | h1(s-1)]
    with exactly one (Bp,2H)@(2H,8H) MXU matmul on the serial path.
    Fused-matmul output column blocks (each 2H = [layer0 | layer1] wide):
        cols 0 :2H  r   :  h0@Whh0_r        | h0@Wih1_r + h1@Whh1_r
        cols 2H:4H  z   :  h0@Whh0_z        | h0@Wih1_z + h1@Whh1_z
        cols 4H:6H  n_hh:  h0@Whh0_n        | h1@Whh1_n      (kept inside r*(...))
        cols 6H:8H  n_ih:  0                | h0@Wih1_n
    """
    Bp = out_ref.shape[0]
    T = x_ref.shape[0] // Bp
    f32 = jnp.float32
    H2, H4, H6, H8 = 2 * H, 4 * H, 6 * H, 8 * H

    # ---- hoisted parameter loads (static slices of the packed slab) --------
    w_fused = slab_ref[0:H2, :]                                       # (2H, 8H)
    bhn = jnp.broadcast_to(slab_ref[ROW_BHN:ROW_BHN + 1, 0:H2], (Bp, H2))

    # ---- Pass 0 (off the serial path): layer-0 input projections for ALL
    # steps, gate-major, widened to the combined 2H layout.  input_size == 1
    # so this is three outer-product broadcasts (pure VPU work).
    # TODO(synk): x is (T*Bp, 1) (1 lane used); a lane-dense x layout would
    # make this pass denser but it is off the serial critical path.
    xv = x_ref[...]                                                   # (T*Bp, 1)
    for g in range(3):                                                # r, z, n
        wrow = slab_ref[ROW_WPRE + g:ROW_WPRE + g + 1, 0:H2]          # (1, 2H)
        brow = slab_ref[ROW_BPRE + g:ROW_BPRE + g + 1, 0:H2]          # (1, 2H)
        pre_ref[g] = xv * wrow + brow                                 # (T*Bp, 2H)

    # ---- fused wavefront step ----------------------------------------------
    def wavefront(pre_off, h01):
        mat = jnp.dot(h01, w_fused, preferred_element_type=f32)       # (Bp, 8H)
        pr = pre_ref[0, pl.ds(pre_off, Bp), :]                        # (Bp, 2H)
        pz = pre_ref[1, pl.ds(pre_off, Bp), :]
        pn = pre_ref[2, pl.ds(pre_off, Bp), :]
        r = jax.nn.sigmoid(pr + mat[:, 0:H2])
        z = jax.nn.sigmoid(pz + mat[:, H2:H4])
        n = jnp.tanh(pn + mat[:, H6:H8] + r * (mat[:, H4:H6] + bhn))
        return (1.0 - z) * n + z * h01

    # ---- wave s = 0: h0(-1) = h1(-1) = 0 -> no matmul needed.  Mask out the
    # (meaningless) layer-1 half so the carry starts as [h0(0) | 0].
    lane = lax.broadcasted_iota(jnp.int32, (1, H2), 1)
    mask0 = (lane < H).astype(f32)
    r0 = jax.nn.sigmoid(pre_ref[0, pl.ds(0, Bp), :])
    z0 = jax.nn.sigmoid(pre_ref[1, pl.ds(0, Bp), :])
    n0 = jnp.tanh(pre_ref[2, pl.ds(0, Bp), :] + r0 * bhn)
    h01 = ((1.0 - z0) * n0) * mask0

    # ---- waves s = 1 .. T-1: one serial matmul each -------------------------
    def body(s, carry):
        off = pl.multiple_of(s * Bp, SUBLANE)
        return wavefront(off, carry)

    h01 = lax.fori_loop(1, T, body, h01, unroll=max(1, min(8, T - 1)))

    # ---- tail wave: layer-1 step T-1.  The layer-0 half of this wave is
    # discarded, so any valid pre_ref offset works (layer-1 half is constant).
    h01 = wavefront((T - 1) * Bp, h01)
    h_last = h01[:, H:H2]                                             # h1(T-1)

    # ---- FC head on the last hidden state (dropout = identity at inference)
    fc1_w = slab_ref[ROW_FC1W:ROW_FC1W + H, 0:F]
    fc1_b = slab_ref[ROW_FC1B:ROW_FC1B + 1, 0:F]
    fc2_w = slab_ref[ROW_FC2W:ROW_FC2W + F, 0:O]
    fc2_b = slab_ref[ROW_FC2B:ROW_FC2B + 1, 0:O]
    y = jnp.maximum(jnp.dot(h_last, fc1_w, preferred_element_type=f32) + fc1_b, 0.0)
    y = jnp.dot(y, fc2_w, preferred_element_type=f32) + fc2_b
    out_ref[...] = y.astype(out_ref.dtype)


def pack_params(params):
    """Pack all 13 weight/bias arrays into one contiguous (SLAB_ROWS, 8H) f32
    slab (single HBM->VMEM DMA), laid out for the fused wavefront step."""
    f32 = jnp.float32
    zH = jnp.zeros((1, H), f32)
    zHH = jnp.zeros((H, H), f32)

    def gate(w, g):                       # (rows, 3H) -> gate-g (rows, H) slice
        return w[:, g * H:(g + 1) * H]

    w_hh0, w_ih1, w_hh1 = params["w_hh0"], params["w_ih1"], params["w_hh1"]

    def col2(top_l0, top_l1, bot_l0, bot_l1):     # rows = [h0 | h1]
        top = jnp.concatenate([top_l0, top_l1], axis=1)
        bot = jnp.concatenate([bot_l0, bot_l1], axis=1)
        return jnp.concatenate([top, bot], axis=0)                 # (2H, 2H)

    blk_r  = col2(gate(w_hh0, 0), gate(w_ih1, 0), zHH, gate(w_hh1, 0))
    blk_z  = col2(gate(w_hh0, 1), gate(w_ih1, 1), zHH, gate(w_hh1, 1))
    blk_nh = col2(gate(w_hh0, 2), zHH,            zHH, gate(w_hh1, 2))
    blk_ni = col2(zHH,            gate(w_ih1, 2), zHH, zHH)
    w_fused = jnp.concatenate([blk_r, blk_z, blk_nh, blk_ni], axis=1)  # (2H, 8H)

    # Layer-0 input-projection rows (layer-1 half zero) and combined bias rows.
    # r/z hh biases fold into the ih biases; the n-gate hh bias stays separate
    # (it must remain inside the r * (...) term, PyTorch GRU semantics).
    w_pre, b_pre = [], []
    for g in range(3):
        w_pre.append(jnp.concatenate([gate(params["w_ih0"], g), zH], axis=1))
        b0g = gate(params["b_ih0"], g)
        b1g = gate(params["b_ih1"], g)
        if g < 2:
            b0g = b0g + gate(params["b_hh0"], g)
            b1g = b1g + gate(params["b_hh1"], g)
        b_pre.append(jnp.concatenate([b0g, b1g], axis=1))
    bhn = jnp.concatenate([gate(params["b_hh0"], 2), gate(params["b_hh1"], 2)], axis=1)

    def pad_cols(a):
        a = a.astype(f32)
        return jnp.pad(a, ((0, 0), (0, SLAB_COLS - a.shape[1])))

    rows = ([w_fused]
            + [pad_cols(w) for w in w_pre]
            + [pad_cols(b) for b in b_pre]
            + [pad_cols(bhn),
               pad_cols(params["fc1_b"]),
               pad_cols(params["fc1_w"]),
               pad_cols(params["fc2_w"]),
               pad_cols(params["fc2_b"])])
    slab = jnp.concatenate(rows, axis=0)
    assert slab.shape == (SLAB_ROWS, SLAB_COLS), slab.shape
    return slab


def gru_model_forward(x, params):
    """x: (B, T) float32 -> (B, OUTPUT) float32."""
    B, T = x.shape
    Bp = ((B + SUBLANE - 1) // SUBLANE) * SUBLANE     # pad batch to sublanes

    # Time-major, batch padded: rows [t*Bp, t*Bp+Bp) of x_flat hold step t.
    x_tb = jnp.transpose(x, (1, 0)).astype(jnp.float32)
    x_tb = jnp.pad(x_tb, ((0, 0), (0, Bp - B)))
    x_flat = x_tb.reshape(T * Bp, 1)

    slab = pack_params(params)

    # TODO(synk): on v7x with B >= 16, make batch a parallel grid axis (2 TCs);
    # at B=4 a single "arbitrary" step is the right shape.
    # TODO(synk): for very long sequences, chunk the (3, T*Bp, 2H) pre-scratch
    # over time instead of materializing it whole (v7x VMEM is 64 MiB).
    out = pl.pallas_call(
        gru_model_kernel,
        out_shape=jax.ShapeDtypeStruct((Bp, OUTPUT), jnp.float32),
        grid=(1,),                       # whole forward pass in one grid step
        in_specs=[pl.BlockSpec((T * Bp, 1), lambda i: (0, 0)),
                  pl.BlockSpec((SLAB_ROWS, SLAB_COLS), lambda i: (0, 0))],
        out_specs=pl.BlockSpec((Bp, OUTPUT), lambda i: (0, 0)),
        scratch_shapes=[pltpu.VMEM((3, T * Bp, 2 * H), jnp.float32)],
        compiler_params=pltpu.CompilerParams(
            dimension_semantics=("arbitrary",)),
    )(x_flat, slab)
    return out[:B]


def gru_model_reference(x, params):
    """Pure-JAX reference matching PyTorch GRU + fc head semantics
    (uses the original, unfused parameters)."""
    B, T = x.shape

    def cell(g_ih, h, w_hh_T, b_hh):
        g_hh = h @ w_hh_T + b_hh
        r = jax.nn.sigmoid(g_ih[:, :H] + g_hh[:, :H])
        z = jax.nn.sigmoid(g_ih[:, H:2 * H] + g_hh[:, H:2 * H])
        n = jnp.tanh(g_ih[:, 2 * H:] + r * g_hh[:, 2 * H:])
        return (1.0 - z) * n + z * h

    h1 = jnp.zeros((B, H), jnp.float32)
    h2 = jnp.zeros((B, H), jnp.float32)
    for t in range(T):
        x_t = x[:, t:t + 1]                                    # (B, 1)
        g1 = x_t * params["w_ih0"] + params["b_ih0"]
        h1 = cell(g1, h1, params["w_hh0"], params["b_hh0"])
        g2 = h1 @ params["w_ih1"] + params["b_ih1"]
        h2 = cell(g2, h2, params["w_hh1"], params["b_hh1"])
    z1 = jnp.maximum(h2 @ params["fc1_w"] + params["fc1_b"], 0.0)
    return z1 @ params["fc2_w"] + params["fc2_b"]


def init_params(key):
    """Deterministic synthetic init.  Weights stored pre-transposed so the
    kernel computes h @ W^T as h @ W_T.  Small nonzero biases exercise the
    bias-folding path (the module inits them to 0; after training they aren't)."""
    ks = jax.random.split(key, 10)
    s = 0.3
    return {
        # layer 0: weight_ih_l0 has shape (3H, 1) -> stored as a (1, 3H) row
        "w_ih0": s * jax.random.normal(ks[0], (1, 3 * H), jnp.float32),
        "w_hh0": s * jax.random.normal(ks[1], (H, 3 * H), jnp.float32),
        "b_ih0": 0.1 * jax.random.normal(ks[2], (1, 3 * H), jnp.float32),
        "b_hh0": 0.1 * jax.random.normal(ks[3], (1, 3 * H), jnp.float32),
        # layer 1: weight_ih_l1 (3H, H) -> (H, 3H)
        "w_ih1": s * jax.random.normal(ks[4], (H, 3 * H), jnp.float32),
        "w_hh1": s * jax.random.normal(ks[5], (H, 3 * H), jnp.float32),
        "b_ih1": 0.1 * jax.random.normal(ks[6], (1, 3 * H), jnp.float32),
        "b_hh1": 0.1 * jax.random.normal(ks[7], (1, 3 * H), jnp.float32),
        # fc head: Linear(H, H//2) then Linear(H//2, O), weights pre-transposed
        "fc1_w": s * jax.random.normal(ks[8], (H, F), jnp.float32),
        "fc1_b": jnp.zeros((1, F), jnp.float32),
        "fc2_w": s * jax.random.normal(ks[9], (F, O), jnp.float32),
        "fc2_b": jnp.zeros((1, O), jnp.float32),
    }


if __name__ == "__main__":
    key = jax.random.PRNGKey(0)
    k_x, k_p = jax.random.split(key)

    B, T = 4, 8
    x = jax.random.normal(k_x, (B, T), jnp.float32)            # (batch, seq)
    params = init_params(k_p)

    out = gru_model_forward(x, params)
    out = jax.block_until_ready(out)

    ref = gru_model_reference(x, params)
    assert out.shape == (B, OUTPUT)
    assert jnp.allclose(out, ref, rtol=1e-4, atol=1e-4), (out, ref)

    # TODO(synk): bidirectional / use_attention branches are not implemented
    # (module defaults disable them); dropout is identity at inference.
    print("KERNEL_OK")
</pallas_src>

<mosaic_0001>
module attributes {stable_mosaic.version = 11 : i64} {
  func.func @gru_model_kernel(%arg0: i32, %arg1: memref<64x1xf32, #tpu.memory_space<vmem>>, %arg2: memref<121x256xf32, #tpu.memory_space<vmem>>, %arg3: memref<8x1xf32, #tpu.memory_space<vmem>>, %arg4: memref<3x64x64xf32, #tpu.memory_space<vmem>>) attributes {dimension_semantics = [#tpu.dimension_semantics<arbitrary>], iteration_bounds = array<i64: 1>, scalar_prefetch = 0 : i64, scratch_operands = 1 : i64, tpu.core_type = #tpu.core_type<tc>, window_params = [{pipeline_mode = #tpu.pipeline_mode<synchronous>, transform_indices = @transform_0, window_bounds = array<i64: 64, 1>}, {pipeline_mode = #tpu.pipeline_mode<synchronous>, transform_indices = @transform_1, window_bounds = array<i64: 121, 256>}, {pipeline_mode = #tpu.pipeline_mode<synchronous>, transform_indices = @transform_2, window_bounds = array<i64: 8, 1>}]} {
    %c0 = arith.constant 0 : index
    %c0_0 = arith.constant 0 : index
    %0 = vector.load %arg2[%c0, %c0_0] : memref<121x256xf32, #tpu.memory_space<vmem>>, vector<64x256xf32>
    %c70 = arith.constant 70 : index
    %c0_1 = arith.constant 0 : index
    %1 = vector.load %arg2[%c70, %c0_1] : memref<121x256xf32, #tpu.memory_space<vmem>>, vector<1x64xf32>
    %2 = vector.shape_cast %1 : vector<1x64xf32> to vector<1x64xf32>
    %3 = vector.broadcast %2 : vector<1x64xf32> to vector<8x64xf32>
    %c0_2 = arith.constant 0 : index
    %c0_3 = arith.constant 0 : index
    %4 = vector.load %arg1[%c0_2, %c0_3] : memref<64x1xf32, #tpu.memory_space<vmem>>, vector<64x1xf32>
    %c64 = arith.constant 64 : index
    %c0_4 = arith.constant 0 : index
    %5 = vector.load %arg2[%c64, %c0_4] : memref<121x256xf32, #tpu.memory_space<vmem>>, vector<1x64xf32>
    %c67 = arith.constant 67 : index
    %c0_5 = arith.constant 0 : index
    %6 = vector.load %arg2[%c67, %c0_5] : memref<121x256xf32, #tpu.memory_space<vmem>>, vector<1x64xf32>
    %7 = vector.broadcast %4 : vector<64x1xf32> to vector<64x64xf32>
    %8 = vector.broadcast %5 : vector<1x64xf32> to vector<64x64xf32>
    %9 = arith.mulf %7, %8 : vector<64x64xf32>
    %10 = vector.broadcast %6 : vector<1x64xf32> to vector<64x64xf32>
    %11 = arith.addf %9, %10 : vector<64x64xf32>
    %c0_6 = arith.constant 0 : index
    %c0_7 = arith.constant 0 : index
    %c0_8 = arith.constant 0 : index
    %12 = vector.load %arg4[%c0_6, %c0_7, %c0_8] : memref<3x64x64xf32, #tpu.memory_space<vmem>>, vector<1x64x64xf32>
    %13 = vector.shape_cast %12 : vector<1x64x64xf32> to vector<64x64xf32>
    %14 = vector.shape_cast %11 : vector<64x64xf32> to vector<1x64x64xf32>
    tpu.vector_store %arg4[%c0_6, %c0_7, %c0_8], %14 {strides = array<i32>} : memref<3x64x64xf32, #tpu.memory_space<vmem>>, vector<1x64x64xf32>,
    %c65 = arith.constant 65 : index
    %c0_9 = arith.constant 0 : index
    %15 = vector.load %arg2[%c65, %c0_9] : memref<121x256xf32, #tpu.memory_space<vmem>>, vector<1x64xf32>
    %c68 = arith.constant 68 : index
    %c0_10 = arith.constant 0 : index
    %16 = vector.load %arg2[%c68, %c0_10] : memref<121x256xf32, #tpu.memory_space<vmem>>, vector<1x64xf32>
    %17 = vector.broadcast %4 : vector<64x1xf32> to vector<64x64xf32>
    %18 = vector.broadcast %15 : vector<1x64xf32> to vector<64x64xf32>
    %19 = arith.mulf %17, %18 : vector<64x64xf32>
    %20 = vector.broadcast %16 : vector<1x64xf32> to vector<64x64xf32>
    %21 = arith.addf %19, %20 : vector<64x64xf32>
    %c1 = arith.constant 1 : index
    %c0_11 = arith.constant 0 : index
    %c0_12 = arith.constant 0 : index
    %22 = vector.load %arg4[%c1, %c0_11, %c0_12] : memref<3x64x64xf32, #tpu.memory_space<vmem>>, vector<1x64x64xf32>
    %23 = vector.shape_cast %22 : vector<1x64x64xf32> to vector<64x64xf32>
    %24 = vector.shape_cast %21 : vector<64x64xf32> to vector<1x64x64xf32>
    tpu.vector_store %arg4[%c1, %c0_11, %c0_12], %24 {strides = array<i32>} : memref<3x64x64xf32, #tpu.memory_space<vmem>>, vector<1x64x64xf32>,
    %c66 = arith.constant 66 : index
    %c0_13 = arith.constant 0 : index
    %25 = vector.load %arg2[%c66, %c0_13] : memref<121x256xf32, #tpu.memory_space<vmem>>, vector<1x64xf32>
    %c69 = arith.constant 69 : index
    %c0_14 = arith.constant 0 : index
    %26 = vector.load %arg2[%c69, %c0_14] : memref<121x256xf32, #tpu.memory_space<vmem>>, vector<1x64xf32>
    %27 = vector.broadcast %4 : vector<64x1xf32> to vector<64x64xf32>
    %28 = vector.broadcast %25 : vector<1x64xf32> to vector<64x64xf32>
    %29 = arith.mulf %27, %28 : vector<64x64xf32>
    %30 = vector.broadcast %26 : vector<1x64xf32> to vector<64x64xf32>
    %31 = arith.addf %29, %30 : vector<64x64xf32>
    %c2 = arith.constant 2 : index
    %c0_15 = arith.constant 0 : index
    %c0_16 = arith.constant 0 : index
    %32 = vector.load %arg4[%c2, %c0_15, %c0_16] : memref<3x64x64xf32, #tpu.memory_space<vmem>>, vector<1x64x64xf32>
    %33 = vector.shape_cast %32 : vector<1x64x64xf32> to vector<64x64xf32>
    %34 = vector.shape_cast %31 : vector<64x64xf32> to vector<1x64x64xf32>
    tpu.vector_store %arg4[%c2, %c0_15, %c0_16], %34 {strides = array<i32>} : memref<3x64x64xf32, #tpu.memory_space<vmem>>, vector<1x64x64xf32>,
    %35 = tpu.iota {dimensions = array<i32: 1>} : vector<1x64xi32>
    %c32_i32 = arith.constant 32 : i32
    %36 = vector.broadcast %c32_i32 : i32 to vector<1x64xi32>
    %37 = arith.cmpi slt, %35, %36 : vector<1x64xi32>
    %38 = arith.extui %37 : vector<1x64xi1> to vector<1x64xi32>
    %39 = arith.sitofp %38 : vector<1x64xi32> to vector<1x64xf32>
    %c0_17 = arith.constant 0 : index
    %c0_18 = arith.constant 0 : index
    %c0_19 = arith.constant 0 : index
    %40 = vector.load %arg4[%c0_17, %c0_18, %c0_19] : memref<3x64x64xf32, #tpu.memory_space<vmem>>, vector<1x8x64xf32>
    %41 = vector.shape_cast %40 : vector<1x8x64xf32> to vector<8x64xf32>
    %42 = arith.negf %41 : vector<8x64xf32>
    %43 = math.exp %42 : vector<8x64xf32>
    %cst = arith.constant 1.000000e+00 : f32
    %44 = vector.broadcast %cst : f32 to vector<8x64xf32>
    %45 = arith.addf %44, %43 : vector<8x64xf32>
    %46 = arith.divf %44, %45 : vector<8x64xf32>
    %c1_20 = arith.constant 1 : index
    %c0_21 = arith.constant 0 : index
    %c0_22 = arith.constant 0 : index
    %47 = vector.load %arg4[%c1_20, %c0_21, %c0_22] : memref<3x64x64xf32, #tpu.memory_space<vmem>>, vector<1x8x64xf32>
    %48 = vector.shape_cast %47 : vector<1x8x64xf32> to vector<8x64xf32>
    %49 = arith.negf %48 : vector<8x64xf32>
    %50 = math.exp %49 : vector<8x64xf32>
    %cst_23 = arith.constant 1.000000e+00 : f32
    %51 = vector.broadcast %cst_23 : f32 to vector<8x64xf32>
    %52 = arith.addf %51, %50 : vector<8x64xf32>
    %53 = arith.divf %51, %52 : vector<8x64xf32>
    %c2_24 = arith.constant 2 : index
    %c0_25 = arith.constant 0 : index
    %c0_26 = arith.constant 0 : index
    %54 = vector.load %arg4[%c2_24, %c0_25, %c0_26] : memref<3x64x64xf32, #tpu.memory_space<vmem>>, vector<1x8x64xf32>
    %55 = vector.shape_cast %54 : vector<1x8x64xf32> to vector<8x64xf32>
    %56 = arith.mulf %46, %3 : vector<8x64xf32>
    %57 = arith.addf %55, %56 : vector<8x64xf32>
    %58 = math.tanh %57 : vector<8x64xf32>
    %cst_27 = arith.constant 1.000000e+00 : f32
    %59 = vector.broadcast %cst_27 : f32 to vector<8x64xf32>
    %60 = arith.subf %59, %53 : vector<8x64xf32>
    %61 = arith.mulf %60, %58 : vector<8x64xf32>
    %62 = vector.broadcast %39 : vector<1x64xf32> to vector<8x64xf32>
    %63 = arith.mulf %61, %62 : vector<8x64xf32>
    %c1_i32 = arith.constant 1 : i32
    %c8_i32 = arith.constant 8 : i32
    %64 = arith.muli %c1_i32, %c8_i32 : i32
    %65 = tpu.assume_multiple %64, 8 : i32
    %cst_28 = arith.constant dense<0.000000e+00> : vector<8x256xf32>
    %66 = tpu.matmul %63, %0, %cst_28 {dimension_numbers = #tpu.dot_dimension_numbers<[1], [0], [0], [1], [0, 0, 1, 1], [], []>} : vector<8x64xf32>, vector<64x256xf32>, vector<8x256xf32> -> vector<8x256xf32>
    %c0_29 = arith.constant 0 : index
    %67 = arith.index_cast %65 : i32 to index
    %c0_30 = arith.constant 0 : index
    %68 = vector.load %arg4[%c0_29, %67, %c0_30] : memref<3x64x64xf32, #tpu.memory_space<vmem>>, vector<1x8x64xf32>
    %69 = vector.shape_cast %68 : vector<1x8x64xf32> to vector<8x64xf32>
    %c1_31 = arith.constant 1 : index
    %70 = arith.index_cast %65 : i32 to index
    %c0_32 = arith.constant 0 : index
    %71 = vector.load %arg4[%c1_31, %70, %c0_32] : memref<3x64x64xf32, #tpu.memory_space<vmem>>, vector<1x8x64xf32>
    %72 = vector.shape_cast %71 : vector<1x8x64xf32> to vector<8x64xf32>
    %c2_33 = arith.constant 2 : index
    %73 = arith.index_cast %65 : i32 to index
    %c0_34 = arith.constant 0 : index
    %74 = vector.load %arg4[%c2_33, %73, %c0_34] : memref<3x64x64xf32, #tpu.memory_space<vmem>>, vector<1x8x64xf32>
    %75 = vector.shape_cast %74 : vector<1x8x64xf32> to vector<8x64xf32>
    %76 = vector.extract_strided_slice %66 {offsets = [0, 0], sizes = [8, 64], strides = [1, 1]} : vector<8x256xf32> to vector<8x64xf32>
    %77 = arith.addf %69, %76 : vector<8x64xf32>
    %78 = arith.negf %77 : vector<8x64xf32>
    %79 = math.exp %78 : vector<8x64xf32>
    %cst_35 = arith.constant 1.000000e+00 : f32
    %80 = vector.broadcast %cst_35 : f32 to vector<8x64xf32>
    %81 = arith.addf %80, %79 : vector<8x64xf32>
    %82 = arith.divf %80, %81 : vector<8x64xf32>
    %83 = vector.extract_strided_slice %66 {offsets = [0, 64], sizes = [8, 64], strides = [1, 1]} : vector<8x256xf32> to vector<8x64xf32>
    %84 = arith.addf %72, %83 : vector<8x64xf32>
    %85 = arith.negf %84 : vector<8x64xf32>
    %86 = math.exp %85 : vector<8x64xf32>
    %cst_36 = arith.constant 1.000000e+00 : f32
    %87 = vector.broadcast %cst_36 : f32 to vector<8x64xf32>
    %88 = arith.addf %87, %86 : vector<8x64xf32>
    %89 = arith.divf %87, %88 : vector<8x64xf32>
    %90 = vector.extract_strided_slice %66 {offsets = [0, 192], sizes = [8, 64], strides = [1, 1]} : vector<8x256xf32> to vector<8x64xf32>
    %91 = arith.addf %75, %90 : vector<8x64xf32>
    %92 = vector.extract_strided_slice %66 {offsets = [0, 128], sizes = [8, 64], strides = [1, 1]} : vector<8x256xf32> to vector<8x64xf32>
    %93 = arith.addf %92, %3 : vector<8x64xf32>
    %94 = arith.mulf %82, %93 : vector<8x64xf32>
    %95 = arith.addf %91, %94 : vector<8x64xf32>
    %96 = math.tanh %95 : vector<8x64xf32>
    %cst_37 = arith.constant 1.000000e+00 : f32
    %97 = vector.broadcast %cst_37 : f32 to vector<8x64xf32>
    %98 = arith.subf %97, %89 : vector<8x64xf32>
    %99 = arith.mulf %98, %96 : vector<8x64xf32>
    %100 = arith.mulf %89, %63 : vector<8x64xf32>
    %101 = arith.addf %99, %100 : vector<8x64xf32>
    %c2_i32 = arith.constant 2 : i32
    %c8_i32_38 = arith.constant 8 : i32
    %102 = arith.muli %c2_i32, %c8_i32_38 : i32
    %103 = tpu.assume_multiple %102, 8 : i32
    %cst_39 = arith.constant dense<0.000000e+00> : vector<8x256xf32>
    %104 = tpu.matmul %101, %0, %cst_39 {dimension_numbers = #tpu.dot_dimension_numbers<[1], [0], [0], [1], [0, 0, 1, 1], [], []>} : vector<8x64xf32>, vector<64x256xf32>, vector<8x256xf32> -> vector<8x256xf32>
    %c0_40 = arith.constant 0 : index
    %105 = arith.index_cast %103 : i32 to index
    %c0_41 = arith.constant 0 : index
    %106 = vector.load %arg4[%c0_40, %105, %c0_41] : memref<3x64x64xf32, #tpu.memory_space<vmem>>, vector<1x8x64xf32>
    %107 = vector.shape_cast %106 : vector<1x8x64xf32> to vector<8x64xf32>
    %c1_42 = arith.constant 1 : index
    %108 = arith.index_cast %103 : i32 to index
    %c0_43 = arith.constant 0 : index
    %109 = vector.load %arg4[%c1_42, %108, %c0_43] : memref<3x64x64xf32, #tpu.memory_space<vmem>>, vector<1x8x64xf32>
    %110 = vector.shape_cast %109 : vector<1x8x64xf32> to vector<8x64xf32>
    %c2_44 = arith.constant 2 : index
    %111 = arith.index_cast %103 : i32 to index
    %c0_45 = arith.constant 0 : index
    %112 = vector.load %arg4[%c2_44, %111, %c0_45] : memref<3x64x64xf32, #tpu.memory_space<vmem>>, vector<1x8x64xf32>
    %113 = vector.shape_cast %112 : vector<1x8x64xf32> to vector<8x64xf32>
    %114 = vector.extract_strided_slice %104 {offsets = [0, 0], sizes = [8, 64], strides = [1, 1]} : vector<8x256xf32> to vector<8x64xf32>
    %115 = arith.addf %107, %114 : vector<8x64xf32>
    %116 = arith.negf %115 : vector<8x64xf32>
    %117 = math.exp %116 : vector<8x64xf32>
    %cst_46 = arith.constant 1.000000e+00 : f32
    %118 = vector.broadcast %cst_46 : f32 to vector<8x64xf32>
    %119 = arith.addf %118, %117 : vector<8x64xf32>
    %120 = arith.divf %118, %119 : vector<8x64xf32>
    %121 = vector.extract_strided_slice %104 {offsets = [0, 64], sizes = [8, 64], strides = [1, 1]} : vector<8x256xf32> to vector<8x64xf32>
    %122 = arith.addf %110, %121 : vector<8x64xf32>
    %123 = arith.negf %122 : vector<8x64xf32>
    %124 = math.exp %123 : vector<8x64xf32>
    %cst_47 = arith.constant 1.000000e+00 : f32
    %125 = vector.broadcast %cst_47 : f32 to vector<8x64xf32>
    %126 = arith.addf %125, %124 : vector<8x64xf32>
    %127 = arith.divf %125, %126 : vector<8x64xf32>
    %128 = vector.extract_strided_slice %104 {offsets = [0, 192], sizes = [8, 64], strides = [1, 1]} : vector<8x256xf32> to vector<8x64xf32>
    %129 = arith.addf %113, %128 : vector<8x64xf32>
    %130 = vector.extract_strided_slice %104 {offsets = [0, 128], sizes = [8, 64], strides = [1, 1]} : vector<8x256xf32> to vector<8x64xf32>
    %131 = arith.addf %130, %3 : vector<8x64xf32>
    %132 = arith.mulf %120, %131 : vector<8x64xf32>
    %133 = arith.addf %129, %132 : vector<8x64xf32>
    %134 = math.tanh %133 : vector<8x64xf32>
    %cst_48 = arith.constant 1.000000e+00 : f32
    %135 = vector.broadcast %cst_48 : f32 to vector<8x64xf32>
    %136 = arith.subf %135, %127 : vector<8x64xf32>
    %137 = arith.mulf %136, %134 : vector<8x64xf32>
    %138 = arith.mulf %127, %101 : vector<8x64xf32>
    %139 = arith.addf %137, %138 : vector<8x64xf32>
    %c3_i32 = arith.constant 3 : i32
    %c8_i32_49 = arith.constant 8 : i32
    %140 = arith.muli %c3_i32, %c8_i32_49 : i32
    %141 = tpu.assume_multiple %140, 8 : i32
    %cst_50 = arith.constant dense<0.000000e+00> : vector<8x256xf32>
    %142 = tpu.matmul %139, %0, %cst_50 {dimension_numbers = #tpu.dot_dimension_numbers<[1], [0], [0], [1], [0, 0, 1, 1], [], []>} : vector<8x64xf32>, vector<64x256xf32>, vector<8x256xf32> -> vector<8x256xf32>
    %c0_51 = arith.constant 0 : index
    %143 = arith.index_cast %141 : i32 to index
    %c0_52 = arith.constant 0 : index
    %144 = vector.load %arg4[%c0_51, %143, %c0_52] : memref<3x64x64xf32, #tpu.memory_space<vmem>>, vector<1x8x64xf32>
    %145 = vector.shape_cast %144 : vector<1x8x64xf32> to vector<8x64xf32>
    %c1_53 = arith.constant 1 : index
    %146 = arith.index_cast %141 : i32 to index
    %c0_54 = arith.constant 0 : index
    %147 = vector.load %arg4[%c1_53, %146, %c0_54] : memref<3x64x64xf32, #tpu.memory_space<vmem>>, vector<1x8x64xf32>
    %148 = vector.shape_cast %147 : vector<1x8x64xf32> to vector<8x64xf32>
    %c2_55 = arith.constant 2 : index
    %149 = arith.index_cast %141 : i32 to index
    %c0_56 = arith.constant 0 : index
    %150 = vector.load %arg4[%c2_55, %149, %c0_56] : memref<3x64x64xf32, #tpu.memory_space<vmem>>, vector<1x8x64xf32>
    %151 = vector.shape_cast %150 : vector<1x8x64xf32> to vector<8x64xf32>
    %152 = vector.extract_strided_slice %142 {offsets = [0, 0], sizes = [8, 64], strides = [1, 1]} : vector<8x256xf32> to vector<8x64xf32>
    %153 = arith.addf %145, %152 : vector<8x64xf32>
    %154 = arith.negf %153 : vector<8x64xf32>
    %155 = math.exp %154 : vector<8x64xf32>
    %cst_57 = arith.constant 1.000000e+00 : f32
    %156 = vector.broadcast %cst_57 : f32 to vector<8x64xf32>
    %157 = arith.addf %156, %155 : vector<8x64xf32>
    %158 = arith.divf %156, %157 : vector<8x64xf32>
    %159 = vector.extract_strided_slice %142 {offsets = [0, 64], sizes = [8, 64], strides = [1, 1]} : vector<8x256xf32> to vector<8x64xf32>
    %160 = arith.addf %148, %159 : vector<8x64xf32>
    %161 = arith.negf %160 : vector<8x64xf32>
    %162 = math.exp %161 : vector<8x64xf32>
    %cst_58 = arith.constant 1.000000e+00 : f32
    %163 = vector.broadcast %cst_58 : f32 to vector<8x64xf32>
    %164 = arith.addf %163, %162 : vector<8x64xf32>
    %165 = arith.divf %163, %164 : vector<8x64xf32>
    %166 = vector.extract_strided_slice %142 {offsets = [0, 192], sizes = [8, 64], strides = [1, 1]} : vector<8x256xf32> to vector<8x64xf32>
    %167 = arith.addf %151, %166 : vector<8x64xf32>
    %168 = vector.extract_strided_slice %142 {offsets = [0, 128], sizes = [8, 64], strides = [1, 1]} : vector<8x256xf32> to vector<8x64xf32>
    %169 = arith.addf %168, %3 : vector<8x64xf32>
    %170 = arith.mulf %158, %169 : vector<8x64xf32>
    %171 = arith.addf %167, %170 : vector<8x64xf32>
    %172 = math.tanh %171 : vector<8x64xf32>
    %cst_59 = arith.constant 1.000000e+00 : f32
    %173 = vector.broadcast %cst_59 : f32 to vector<8x64xf32>
    %174 = arith.subf %173, %165 : vector<8x64xf32>
    %175 = arith.mulf %174, %172 : vector<8x64xf32>
    %176 = arith.mulf %165, %139 : vector<8x64xf32>
    %177 = arith.addf %175, %176 : vector<8x64xf32>
    %c4_i32 = arith.constant 4 : i32
    %c8_i32_60 = arith.constant 8 : i32
    %178 = arith.muli %c4_i32, %c8_i32_60 : i32
    %179 = tpu.assume_multiple %178, 8 : i32
    %cst_61 = arith.constant dense<0.000000e+00> : vector<8x256xf32>
    %180 = tpu.matmul %177, %0, %cst_61 {dimension_numbers = #tpu.dot_dimension_numbers<[1], [0], [0], [1], [0, 0, 1, 1], [], []>} : vector<8x64xf32>, vector<64x256xf32>, vector<8x256xf32> -> vector<8x256xf32>
    %c0_62 = arith.constant 0 : index
    %181 = arith.index_cast %179 : i32 to index
    %c0_63 = arith.constant 0 : index
    %182 = vector.load %arg4[%c0_62, %181, %c0_63] : memref<3x64x64xf32, #tpu.memory_space<vmem>>, vector<1x8x64xf32>
    %183 = vector.shape_cast %182 : vector<1x8x64xf32> to vector<8x64xf32>
    %c1_64 = arith.constant 1 : index
    %184 = arith.index_cast %179 : i32 to index
    %c0_65 = arith.constant 0 : index
    %185 = vector.load %arg4[%c1_64, %184, %c0_65] : memref<3x64x64xf32, #tpu.memory_space<vmem>>, vector<1x8x64xf32>
    %186 = vector.shape_cast %185 : vector<1x8x64xf32> to vector<8x64xf32>
    %c2_66 = arith.constant 2 : index
    %187 = arith.index_cast %179 : i32 to index
    %c0_67 = arith.constant 0 : index
    %188 = vector.load %arg4[%c2_66, %187, %c0_67] : memref<3x64x64xf32, #tpu.memory_space<vmem>>, vector<1x8x64xf32>
    %189 = vector.shape_cast %188 : vector<1x8x64xf32> to vector<8x64xf32>
    %190 = vector.extract_strided_slice %180 {offsets = [0, 0], sizes = [8, 64], strides = [1, 1]} : vector<8x256xf32> to vector<8x64xf32>
    %191 = arith.addf %183, %190 : vector<8x64xf32>
    %192 = arith.negf %191 : vector<8x64xf32>
    %193 = math.exp %192 : vector<8x64xf32>
    %cst_68 = arith.constant 1.000000e+00 : f32
    %194 = vector.broadcast %cst_68 : f32 to vector<8x64xf32>
    %195 = arith.addf %194, %193 : vector<8x64xf32>
    %196 = arith.divf %194, %195 : vector<8x64xf32>
    %197 = vector.extract_strided_slice %180 {offsets = [0, 64], sizes = [8, 64], strides = [1, 1]} : vector<8x256xf32> to vector<8x64xf32>
    %198 = arith.addf %186, %197 : vector<8x64xf32>
    %199 = arith.negf %198 : vector<8x64xf32>
    %200 = math.exp %199 : vector<8x64xf32>
    %cst_69 = arith.constant 1.000000e+00 : f32
    %201 = vector.broadcast %cst_69 : f32 to vector<8x64xf32>
    %202 = arith.addf %201, %200 : vector<8x64xf32>
    %203 = arith.divf %201, %202 : vector<8x64xf32>
    %204 = vector.extract_strided_slice %180 {offsets = [0, 192], sizes = [8, 64], strides = [1, 1]} : vector<8x256xf32> to vector<8x64xf32>
    %205 = arith.addf %189, %204 : vector<8x64xf32>
    %206 = vector.extract_strided_slice %180 {offsets = [0, 128], sizes = [8, 64], strides = [1, 1]} : vector<8x256xf32> to vector<8x64xf32>
    %207 = arith.addf %206, %3 : vector<8x64xf32>
    %208 = arith.mulf %196, %207 : vector<8x64xf32>
    %209 = arith.addf %205, %208 : vector<8x64xf32>
    %210 = math.tanh %209 : vector<8x64xf32>
    %cst_70 = arith.constant 1.000000e+00 : f32
    %211 = vector.broadcast %cst_70 : f32 to vector<8x64xf32>
    %212 = arith.subf %211, %203 : vector<8x64xf32>
    %213 = arith.mulf %212, %210 : vector<8x64xf32>
    %214 = arith.mulf %203, %177 : vector<8x64xf32>
    %215 = arith.addf %213, %214 : vector<8x64xf32>
    %c5_i32 = arith.constant 5 : i32
    %c8_i32_71 = arith.constant 8 : i32
    %216 = arith.muli %c5_i32, %c8_i32_71 : i32
    %217 = tpu.assume_multiple %216, 8 : i32
    %cst_72 = arith.constant dense<0.000000e+00> : vector<8x256xf32>
    %218 = tpu.matmul %215, %0, %cst_72 {dimension_numbers = #tpu.dot_dimension_numbers<[1], [0], [0], [1], [0, 0, 1, 1], [], []>} : vector<8x64xf32>, vector<64x256xf32>, vector<8x256xf32> -> vector<8x256xf32>
    %c0_73 = arith.constant 0 : index
    %219 = arith.index_cast %217 : i32 to index
    %c0_74 = arith.constant 0 : index
    %220 = vector.load %arg4[%c0_73, %219, %c0_74] : memref<3x64x64xf32, #tpu.memory_space<vmem>>, vector<1x8x64xf32>
    %221 = vector.shape_cast %220 : vector<1x8x64xf32> to vector<8x64xf32>
    %c1_75 = arith.constant 1 : index
    %222 = arith.index_cast %217 : i32 to index
    %c0_76 = arith.constant 0 : index
    %223 = vector.load %arg4[%c1_75, %222, %c0_76] : memref<3x64x64xf32, #tpu.memory_space<vmem>>, vector<1x8x64xf32>
    %224 = vector.shape_cast %223 : vector<1x8x64xf32> to vector<8x64xf32>
    %c2_77 = arith.constant 2 : index
    %225 = arith.index_cast %217 : i32 to index
    %c0_78 = arith.constant 0 : index
    %226 = vector.load %arg4[%c2_77, %225, %c0_78] : memref<3x64x64xf32, #tpu.memory_space<vmem>>, vector<1x8x64xf32>
    %227 = vector.shape_cast %226 : vector<1x8x64xf32> to vector<8x64xf32>
    %228 = vector.extract_strided_slice %218 {offsets = [0, 0], sizes = [8, 64], strides = [1, 1]} : vector<8x256xf32> to vector<8x64xf32>
    %229 = arith.addf %221, %228 : vector<8x64xf32>
    %230 = arith.negf %229 : vector<8x64xf32>
    %231 = math.exp %230 : vector<8x64xf32>
    %cst_79 = arith.constant 1.000000e+00 : f32
    %232 = vector.broadcast %cst_79 : f32 to vector<8x64xf32>
    %233 = arith.addf %232, %231 : vector<8x64xf32>
    %234 = arith.divf %232, %233 : vector<8x64xf32>
    %235 = vector.extract_strided_slice %218 {offsets = [0, 64], sizes = [8, 64], strides = [1, 1]} : vector<8x256xf32> to vector<8x64xf32>
    %236 = arith.addf %224, %235 : vector<8x64xf32>
    %237 = arith.negf %236 : vector<8x64xf32>
    %238 = math.exp %237 : vector<8x64xf32>
    %cst_80 = arith.constant 1.000000e+00 : f32
    %239 = vector.broadcast %cst_80 : f32 to vector<8x64xf32>
    %240 = arith.addf %239, %238 : vector<8x64xf32>
    %241 = arith.divf %239, %240 : vector<8x64xf32>
    %242 = vector.extract_strided_slice %218 {offsets = [0, 192], sizes = [8, 64], strides = [1, 1]} : vector<8x256xf32> to vector<8x64xf32>
    %243 = arith.addf %227, %242 : vector<8x64xf32>
    %244 = vector.extract_strided_slice %218 {offsets = [0, 128], sizes = [8, 64], strides = [1, 1]} : vector<8x256xf32> to vector<8x64xf32>
    %245 = arith.addf %244, %3 : vector<8x64xf32>
    %246 = arith.mulf %234, %245 : vector<8x64xf32>
    %247 = arith.addf %243, %246 : vector<8x64xf32>
    %248 = math.tanh %247 : vector<8x64xf32>
    %cst_81 = arith.constant 1.000000e+00 : f32
    %249 = vector.broadcast %cst_81 : f32 to vector<8x64xf32>
    %250 = arith.subf %249, %241 : vector<8x64xf32>
    %251 = arith.mulf %250, %248 : vector<8x64xf32>
    %252 = arith.mulf %241, %215 : vector<8x64xf32>
    %253 = arith.addf %251, %252 : vector<8x64xf32>
    %c6_i32 = arith.constant 6 : i32
    %c8_i32_82 = arith.constant 8 : i32
    %254 = arith.muli %c6_i32, %c8_i32_82 : i32
    %255 = tpu.assume_multiple %254, 8 : i32
    %cst_83 = arith.constant dense<0.000000e+00> : vector<8x256xf32>
    %256 = tpu.matmul %253, %0, %cst_83 {dimension_numbers = #tpu.dot_dimension_numbers<[1], [0], [0], [1], [0, 0, 1, 1], [], []>} : vector<8x64xf32>, vector<64x256xf32>, vector<8x256xf32> -> vector<8x256xf32>
    %c0_84 = arith.constant 0 : index
    %257 = arith.index_cast %255 : i32 to index
    %c0_85 = arith.constant 0 : index
    %258 = vector.load %arg4[%c0_84, %257, %c0_85] : memref<3x64x64xf32, #tpu.memory_space<vmem>>, vector<1x8x64xf32>
    %259 = vector.shape_cast %258 : vector<1x8x64xf32> to vector<8x64xf32>
    %c1_86 = arith.constant 1 : index
    %260 = arith.index_cast %255 : i32 to index
    %c0_87 = arith.constant 0 : index
    %261 = vector.load %arg4[%c1_86, %260, %c0_87] : memref<3x64x64xf32, #tpu.memory_space<vmem>>, vector<1x8x64xf32>
    %262 = vector.shape_cast %261 : vector<1x8x64xf32> to vector<8x64xf32>
    %c2_88 = arith.constant 2 : index
    %263 = arith.index_cast %255 : i32 to index
    %c0_89 = arith.constant 0 : index
    %264 = vector.load %arg4[%c2_88, %263, %c0_89] : memref<3x64x64xf32, #tpu.memory_space<vmem>>, vector<1x8x64xf32>
    %265 = vector.shape_cast %264 : vector<1x8x64xf32> to vector<8x64xf32>
    %266 = vector.extract_strided_slice %256 {offsets = [0, 0], sizes = [8, 64], strides = [1, 1]} : vector<8x256xf32> to vector<8x64xf32>
    %267 = arith.addf %259, %266 : vector<8x64xf32>
    %268 = arith.negf %267 : vector<8x64xf32>
    %269 = math.exp %268 : vector<8x64xf32>
    %cst_90 = arith.constant 1.000000e+00 : f32
    %270 = vector.broadcast %cst_90 : f32 to vector<8x64xf32>
    %271 = arith.addf %270, %269 : vector<8x64xf32>
    %272 = arith.divf %270, %271 : vector<8x64xf32>
    %273 = vector.extract_strided_slice %256 {offsets = [0, 64], sizes = [8, 64], strides = [1, 1]} : vector<8x256xf32> to vector<8x64xf32>
    %274 = arith.addf %262, %273 : vector<8x64xf32>
    %275 = arith.negf %274 : vector<8x64xf32>
    %276 = math.exp %275 : vector<8x64xf32>
    %cst_91 = arith.constant 1.000000e+00 : f32
    %277 = vector.broadcast %cst_91 : f32 to vector<8x64xf32>
    %278 = arith.addf %277, %276 : vector<8x64xf32>
    %279 = arith.divf %277, %278 : vector<8x64xf32>
    %280 = vector.extract_strided_slice %256 {offsets = [0, 192], sizes = [8, 64], strides = [1, 1]} : vector<8x256xf32> to vector<8x64xf32>
    %281 = arith.addf %265, %280 : vector<8x64xf32>
    %282 = vector.extract_strided_slice %256 {offsets = [0, 128], sizes = [8, 64], strides = [1, 1]} : vector<8x256xf32> to vector<8x64xf32>
    %283 = arith.addf %282, %3 : vector<8x64xf32>
    %284 = arith.mulf %272, %283 : vector<8x64xf32>
    %285 = arith.addf %281, %284 : vector<8x64xf32>
    %286 = math.tanh %285 : vector<8x64xf32>
    %cst_92 = arith.constant 1.000000e+00 : f32
    %287 = vector.broadcast %cst_92 : f32 to vector<8x64xf32>
    %288 = arith.subf %287, %279 : vector<8x64xf32>
    %289 = arith.mulf %288, %286 : vector<8x64xf32>
    %290 = arith.mulf %279, %253 : vector<8x64xf32>
    %291 = arith.addf %289, %290 : vector<8x64xf32>
    %c7_i32 = arith.constant 7 : i32
    %c8_i32_93 = arith.constant 8 : i32
    %292 = arith.muli %c7_i32, %c8_i32_93 : i32
    %293 = tpu.assume_multiple %292, 8 : i32
    %cst_94 = arith.constant dense<0.000000e+00> : vector<8x256xf32>
    %294 = tpu.matmul %291, %0, %cst_94 {dimension_numbers = #tpu.dot_dimension_numbers<[1], [0], [0], [1], [0, 0, 1, 1], [], []>} : vector<8x64xf32>, vector<64x256xf32>, vector<8x256xf32> -> vector<8x256xf32>
    %c0_95 = arith.constant 0 : index
    %295 = arith.index_cast %293 : i32 to index
    %c0_96 = arith.constant 0 : index
    %296 = vector.load %arg4[%c0_95, %295, %c0_96] : memref<3x64x64xf32, #tpu.memory_space<vmem>>, vector<1x8x64xf32>
    %297 = vector.shape_cast %296 : vector<1x8x64xf32> to vector<8x64xf32>
    %c1_97 = arith.constant 1 : index
    %298 = arith.index_cast %293 : i32 to index
    %c0_98 = arith.constant 0 : index
    %299 = vector.load %arg4[%c1_97, %298, %c0_98] : memref<3x64x64xf32, #tpu.memory_space<vmem>>, vector<1x8x64xf32>
    %300 = vector.shape_cast %299 : vector<1x8x64xf32> to vector<8x64xf32>
    %c2_99 = arith.constant 2 : index
    %301 = arith.index_cast %293 : i32 to index
    %c0_100 = arith.constant 0 : index
    %302 = vector.load %arg4[%c2_99, %301, %c0_100] : memref<3x64x64xf32, #tpu.memory_space<vmem>>, vector<1x8x64xf32>
    %303 = vector.shape_cast %302 : vector<1x8x64xf32> to vector<8x64xf32>
    %304 = vector.extract_strided_slice %294 {offsets = [0, 0], sizes = [8, 64], strides = [1, 1]} : vector<8x256xf32> to vector<8x64xf32>
    %305 = arith.addf %297, %304 : vector<8x64xf32>
    %306 = arith.negf %305 : vector<8x64xf32>
    %307 = math.exp %306 : vector<8x64xf32>
    %cst_101 = arith.constant 1.000000e+00 : f32
    %308 = vector.broadcast %cst_101 : f32 to vector<8x64xf32>
    %309 = arith.addf %308, %307 : vector<8x64xf32>
    %310 = arith.divf %308, %309 : vector<8x64xf32>
    %311 = vector.extract_strided_slice %294 {offsets = [0, 64], sizes = [8, 64], strides = [1, 1]} : vector<8x256xf32> to vector<8x64xf32>
    %312 = arith.addf %300, %311 : vector<8x64xf32>
    %313 = arith.negf %312 : vector<8x64xf32>
    %314 = math.exp %313 : vector<8x64xf32>
    %cst_102 = arith.constant 1.000000e+00 : f32
    %315 = vector.broadcast %cst_102 : f32 to vector<8x64xf32>
    %316 = arith.addf %315, %314 : vector<8x64xf32>
    %317 = arith.divf %315, %316 : vector<8x64xf32>
    %318 = vector.extract_strided_slice %294 {offsets = [0, 192], sizes = [8, 64], strides = [1, 1]} : vector<8x256xf32> to vector<8x64xf32>
    %319 = arith.addf %303, %318 : vector<8x64xf32>
    %320 = vector.extract_strided_slice %294 {offsets = [0, 128], sizes = [8, 64], strides = [1, 1]} : vector<8x256xf32> to vector<8x64xf32>
    %321 = arith.addf %320, %3 : vector<8x64xf32>
    %322 = arith.mulf %310, %321 : vector<8x64xf32>
    %323 = arith.addf %319, %322 : vector<8x64xf32>
    %324 = math.tanh %323 : vector<8x64xf32>
    %cst_103 = arith.constant 1.000000e+00 : f32
    %325 = vector.broadcast %cst_103 : f32 to vector<8x64xf32>
    %326 = arith.subf %325, %317 : vector<8x64xf32>
    %327 = arith.mulf %326, %324 : vector<8x64xf32>
    %328 = arith.mulf %317, %291 : vector<8x64xf32>
    %329 = arith.addf %327, %328 : vector<8x64xf32>
    %c7_i32_104 = arith.constant 7 : i32
    %cst_105 = arith.constant dense<0.000000e+00> : vector<8x256xf32>
    %330 = tpu.matmul %329, %0, %cst_105 {dimension_numbers = #tpu.dot_dimension_numbers<[1], [0], [0], [1], [0, 0, 1, 1], [], []>} : vector<8x64xf32>, vector<64x256xf32>, vector<8x256xf32> -> vector<8x256xf32>
    %c0_106 = arith.constant 0 : index
    %c56 = arith.constant 56 : index
    %c0_107 = arith.constant 0 : index
    %331 = vector.load %arg4[%c0_106, %c56, %c0_107] : memref<3x64x64xf32, #tpu.memory_space<vmem>>, vector<1x8x64xf32>
    %332 = vector.shape_cast %331 : vector<1x8x64xf32> to vector<8x64xf32>
    %c1_108 = arith.constant 1 : index
    %c56_109 = arith.constant 56 : index
    %c0_110 = arith.constant 0 : index
    %333 = vector.load %arg4[%c1_108, %c56_109, %c0_110] : memref<3x64x64xf32, #tpu.memory_space<vmem>>, vector<1x8x64xf32>
    %334 = vector.shape_cast %333 : vector<1x8x64xf32> to vector<8x64xf32>
    %c2_111 = arith.constant 2 : index
    %c56_112 = arith.constant 56 : index
    %c0_113 = arith.constant 0 : index
    %335 = vector.load %arg4[%c2_111, %c56_112, %c0_113] : memref<3x64x64xf32, #tpu.memory_space<vmem>>, vector<1x8x64xf32>
    %336 = vector.shape_cast %335 : vector<1x8x64xf32> to vector<8x64xf32>
    %337 = vector.extract_strided_slice %330 {offsets = [0, 0], sizes = [8, 64], strides = [1, 1]} : vector<8x256xf32> to vector<8x64xf32>
    %338 = arith.addf %332, %337 : vector<8x64xf32>
    %339 = arith.negf %338 : vector<8x64xf32>
    %340 = math.exp %339 : vector<8x64xf32>
    %cst_114 = arith.constant 1.000000e+00 : f32
    %341 = vector.broadcast %cst_114 : f32 to vector<8x64xf32>
    %342 = arith.addf %341, %340 : vector<8x64xf32>
    %343 = arith.divf %341, %342 : vector<8x64xf32>
    %344 = vector.extract_strided_slice %330 {offsets = [0, 64], sizes = [8, 64], strides = [1, 1]} : vector<8x256xf32> to vector<8x64xf32>
    %345 = arith.addf %334, %344 : vector<8x64xf32>
    %346 = arith.negf %345 : vector<8x64xf32>
    %347 = math.exp %346 : vector<8x64xf32>
    %cst_115 = arith.constant 1.000000e+00 : f32
    %348 = vector.broadcast %cst_115 : f32 to vector<8x64xf32>
    %349 = arith.addf %348, %347 : vector<8x64xf32>
    %350 = arith.divf %348, %349 : vector<8x64xf32>
    %351 = vector.extract_strided_slice %330 {offsets = [0, 192], sizes = [8, 64], strides = [1, 1]} : vector<8x256xf32> to vector<8x64xf32>
    %352 = arith.addf %336, %351 : vector<8x64xf32>
    %353 = vector.extract_strided_slice %330 {offsets = [0, 128], sizes = [8, 64], strides = [1, 1]} : vector<8x256xf32> to vector<8x64xf32>
    %354 = arith.addf %353, %3 : vector<8x64xf32>
    %355 = arith.mulf %343, %354 : vector<8x64xf32>
    %356 = arith.addf %352, %355 : vector<8x64xf32>
    %357 = math.tanh %356 : vector<8x64xf32>
    %cst_116 = arith.constant 1.000000e+00 : f32
    %358 = vector.broadcast %cst_116 : f32 to vector<8x64xf32>
    %359 = arith.subf %358, %350 : vector<8x64xf32>
    %360 = arith.mulf %359, %357 : vector<8x64xf32>
    %361 = arith.mulf %350, %329 : vector<8x64xf32>
    %362 = arith.addf %360, %361 : vector<8x64xf32>
    %363 = vector.extract_strided_slice %362 {offsets = [0, 32], sizes = [8, 32], strides = [1, 1]} : vector<8x64xf32> to vector<8x32xf32>
    %c72 = arith.constant 72 : index
    %c0_117 = arith.constant 0 : index
    %364 = vector.load %arg2[%c72, %c0_117] : memref<121x256xf32, #tpu.memory_space<vmem>>, vector<32x16xf32>
    %c71 = arith.constant 71 : index
    %c0_118 = arith.constant 0 : index
    %365 = vector.load %arg2[%c71, %c0_118] : memref<121x256xf32, #tpu.memory_space<vmem>>, vector<1x16xf32>
    %c104 = arith.constant 104 : index
    %c0_119 = arith.constant 0 : index
    %366 = vector.load %arg2[%c104, %c0_119] : memref<121x256xf32, #tpu.memory_space<vmem>>, vector<16x1xf32>
    %c120 = arith.constant 120 : index
    %c0_120 = arith.constant 0 : index
    %367 = vector.load %arg2[%c120, %c0_120] : memref<121x256xf32, #tpu.memory_space<vmem>>, vector<1x1xf32>
    %cst_121 = arith.constant dense<0.000000e+00> : vector<8x16xf32>
    %368 = tpu.matmul %363, %364, %cst_121 {dimension_numbers = #tpu.dot_dimension_numbers<[1], [0], [0], [1], [0, 0, 1, 1], [], []>} : vector<8x32xf32>, vector<32x16xf32>, vector<8x16xf32> -> vector<8x16xf32>
    %369 = vector.broadcast %365 : vector<1x16xf32> to vector<8x16xf32>
    %370 = arith.addf %368, %369 : vector<8x16xf32>
    %cst_122 = arith.constant 0.000000e+00 : f32
    %371 = vector.broadcast %cst_122 : f32 to vector<8x16xf32>
    %372 = arith.maximumf %370, %371 : vector<8x16xf32>
    %cst_123 = arith.constant dense<0.000000e+00> : vector<8x1xf32>
    %373 = tpu.matmul %372, %366, %cst_123 {dimension_numbers = #tpu.dot_dimension_numbers<[1], [0], [0], [1], [0, 0, 1, 1], [], []>} : vector<8x16xf32>, vector<16x1xf32>, vector<8x1xf32> -> vector<8x1xf32>
    %374 = vector.broadcast %367 : vector<1x1xf32> to vector<8x1xf32>
    %375 = arith.addf %373, %374 : vector<8x1xf32>
    %c0_124 = arith.constant 0 : index
    %c0_125 = arith.constant 0 : index
    %376 = vector.load %arg3[%c0_124, %c0_125] : memref<8x1xf32, #tpu.memory_space<vmem>>, vector<8x1xf32>
    tpu.vector_store %arg3[%c0_124, %c0_125], %375 {strides = array<i32>} : memref<8x1xf32, #tpu.memory_space<vmem>>, vector<8x1xf32>,
    return
  }
  func.func @transform_0(%arg0: i32) -> (i32, i32) {
    %c0_i32 = arith.constant 0 : i32
    %c0_i32_0 = arith.constant 0 : i32
    %c0_i32_1 = arith.constant 0 : i32
    return %c0_i32, %c0_i32_0 : i32, i32
  }
  func.func @transform_1(%arg0: i32) -> (i32, i32) {
    %c0_i32 = arith.constant 0 : i32
    %c0_i32_0 = arith.constant 0 : i32
    %c0_i32_1 = arith.constant 0 : i32
    return %c0_i32, %c0_i32_0 : i32, i32
  }
  func.func @transform_2(%arg0: i32) -> (i32, i32) {
    %c0_i32 = arith.constant 0 : i32
    %c0_i32_0 = arith.constant 0 : i32
    %c0_i32_1 = arith.constant 0 : i32
    return %c0_i32, %c0_i32_0 : i32, i32
  }
}

</mosaic_0001>

<bundles_post_ra>
// kernel: tpu_custom_call.1
= control target key start
LH: loop header
LB: loop body
LE: loop exit
PB: predicated region body
PF: predicated region fallthrough
CT: control target
= control target key end

     0   :  { %7 = vsyncpa [#allocation4], 0  ;;  %s1593_s9 = smov [#allocation3]   ;;  %s1870_s0 = inlined_call_operand.vmem [shape: f32[64,1], index: 0, kind: input, shape index: {}]   ;;  %s1871_s1 = inlined_call_operand.hbm [shape: f32[121,256], index: 1, kind: input, shape index: {}]   ;;  %s1872_s2 = inlined_call_operand.vmem [shape: f32[8,1], index: 2, kind: output, shape index: {}]  }
   0x1   :  { %s15_s10 = sshll.u32 %s1593_s9, 4  ;;  %s1569_s13 = scalar_lea.hbm %s1871_s1, 4096  ;;  %s16_s10 = int_to_ptr.vmem [resolvable:$true] %s15_s10 }
   0x2   :  { %p1570_p0 = scmp.ne.s32.totalorder %s1871_s1, %s1569_s13  ;;  %p1573_p1 = scmp.lt.u32.totalorder %s1569_s13, %s1871_s1 }
   0x4   :  { %p1575_p2 = pnand %p1573_p1, %p1570_p0 }
   0x6   :  { %1578 = shalt.err (!%p1575_p2)
}
   0x7   :  { %s1579_s18 = scalar_lea.vmem %s16_s10, 4096  ;;  %p1584_p4 = scmp.lt.s32.totalorder %s16_s10, %s16_s10 }
   0x8   :  { %p1580_p3 = scmp.ne.s32.totalorder %s16_s10, %s1579_s18  ;;  %p1585_p5 = scmp.lt.s32.totalorder %s1579_s18, %s1579_s18 }
   0xa   :  { %p1586_p6 = por %p1585_p5, %p1584_p4 }
   0xc   :  { %p1587_p7 = pnand %p1586_p6, %p1580_p3 }
   0xe   :  { %1590 = shalt.err (!%p1587_p7)
}
   0xf   :  { %s1594_s19 = smov 256   ;;  %s1595_s20 = smov 16  }
  0x10   :  { %21 = dma.hbm_to_vmem [thread:$0]  %s1871_s1, 4096, %s16_s10, [#allocation4], %s1594_s19, %s1594_s19, %s1595_s20  }
  0x11   :  { %1591 = dma.done.wait [#allocation4], 4096  }
  0x12   :  { %1592 = vsyncadd [#allocation4], 4294963200  ;;  %v1596_v0 = vmov 0   ;;  %v42_v1 = vld [vmem:[%s1870_s0] sm:$0xff]  ;;  %v43_v2 = vld [vmem:[%s1870_s0 + $0x8] sm:$0xff]  ;;  %v1597_v11 = vmov 0.0  }
  0x13   :  { %1477 = vset.pattern.permute.xlu0 %v1596_v0  ;;  %1478 = vset.pattern.permute.xlu1 %v1596_v0  ;;  %v44_v3 = vld [vmem:[%s1870_s0 + $0x10] sm:$0xff]  ;;  %v26_v4 = vld [vmem:[#allocation3 + $0x8] sm:$0xff]  ;;  %v28_v5 = vld [vmem:[#allocation3 + $0x18] sm:$0xff]  ;;  %vm108_vm0 = vcmask 523264   ;;  %s1598_s1 = smov 64   ;;  %vm1600_vm2 = vmmov 0  }
  0x14   :  { %54 = vperm.xlu0 %1477, %v42_v1   ;;  %v25_v6 = vld [vmem:[#allocation3] sm:$0xff]  ;;  %v1638_v7 = vpack.c.bf16 %v28_v5, %v26_v4  ;;  %v27_v8 = vld [vmem:[#allocation3 + $0x10] sm:$0xff]  ;;  %v30_v9 = vld [vmem:[#allocation3 + $0x28] sm:$0xff]  ;;  %264 = vmatprep.mubr.f32.mxu0 %v1597_v11  ;;  %v171_v5 = vlaneseq  ;;  %vm1107_vm3 = vcmask 261120   ;;  %vm1181_vm4 = vcmask 130048  }
  0x15   :  { %v32_v10 = vld [vmem:[#allocation3 + $0x38] sm:$0xff]  ;;  %377 = vmatprep.mubr.f32.mxu1 %v1597_v11  ;;  %v1642_v12 = vpack.c.bf16 %v27_v8, %v25_v6  ;;  %v29_v14 = vld [vmem:[#allocation3 + $0x20] sm:$0xff]  ;;  %v31_v15 = vld [vmem:[#allocation3 + $0x30] sm:$0xff]  ;;  %vm1255_vm5 = vcmask 7168  }
  0x16   :  { %v1644_v13 = vpack.c.bf16 %v32_v10, %v30_v9  ;;  %v34_v16 = vld [vmem:[#allocation3 + $0x48] sm:$0xff]  ;;  %1332 = vmatprep.subr.bf16.mxu0 %v1638_v7  ;;  %v36_v17 = vld [vmem:[#allocation3 + $0x58] sm:$0xff]  ;;  %1348 = vmatprep.subr.bf16.mxu1 %v1638_v7  ;;  %v1649_v18 = vpack.c.bf16 %v31_v15, %v29_v14  ;;  %v33_v20 = vld [vmem:[#allocation3 + $0x40] sm:$0xff]  ;;  %v172_v6 = vand.u32 127, %v171_v5 }
  0x17   :  { %1334 = vmatpush1.bf16.msra.mxu0 %v1642_v12  ;;  %1350 = vmatpush1.bf16.msra.mxu1 %v1642_v12  ;;  %v1653_v19 = vpack.c.bf16 %v36_v17, %v34_v16  ;;  %v35_v21 = vld [vmem:[#allocation3 + $0x50] sm:$0xff]  ;;  %v38_v22 = vld [vmem:[#allocation3 + $0x68] sm:$0xff]  ;;  %v40_v23 = vld [vmem:[#allocation3 + $0x78] sm:$0xff] }
  0x18   :  { %59 = vperm.xlu0 %1477, %v43_v2   ;;  %1336 = vmatprep.subr.bf16.mxu0 %v1644_v13  ;;  %v1657_v24 = vpack.c.bf16 %v35_v21, %v33_v20  ;;  %v1661_v25 = vpack.c.bf16 %v40_v23, %v38_v22  ;;  %v37_v26 = vld [vmem:[#allocation3 + $0x60] sm:$0xff]  ;;  %v39_v27 = vld [vmem:[#allocation3 + $0x70] sm:$0xff]  ;;  %vm173_vm1 = vcmp.lt.s32.totalorder %v172_v6, 32 }
  0x19   :  { %1352 = vmatprep.subr.bf16.mxu1 %v1644_v13  ;;  %v1665_v28 = vpack.c.bf16 %v39_v27, %v37_v26  ;;  %v1674_v29 = vld [vmem:[#allocation3 + $0x80] ss:$0 sm:$0xff]  ;;  %v1676_v30 = vld [vmem:[#allocation3 + $0x81] ss:$0 sm:$0xff]  ;;  %v1678_v31 = vld [vmem:[#allocation3 + $0x82] ss:$0 sm:$0xff] }
  0x1a   :  { %v1680_v32 = vld [vmem:[#allocation3 + $0x83] ss:$0 sm:$0xff]  ;;  %v1682_v33 = vld [vmem:[#allocation3 + $0x84] ss:$0 sm:$0xff]  ;;  %v1684_v34 = vld [vmem:[#allocation3 + $0x85] ss:$0 sm:$0xff] }
  0x1b   :  { %1338 = vmatpush1.bf16.msra.mxu0 %v1649_v18  ;;  %1354 = vmatpush1.bf16.msra.mxu1 %v1649_v18  ;;  %v1713_v0 = vld [vmem:[#allocation3 + $0x86] ss:$0 sm:$0xff]  ;;  %v1276_v14 = vsel %vm173_vm1, 1.0, %v1597_v11 }
  0x1c   :  { %64 = vperm.xlu0 %1477, %v44_v3   ;;  %1340 = vmatprep.subr.bf16.mxu0 %v1653_v19 }
  0x1d   :  { %1356 = vmatprep.subr.bf16.mxu1 %v1653_v19 }
  0x1f   :  { %1342 = vmatpush1.bf16.msra.mxu0 %v1657_v24  ;;  %1358 = vmatpush1.bf16.msra.mxu1 %v1657_v24 }
  0x20   :  { %1344 = vmatprep.subr.bf16.mxu0 %v1661_v25  ;;  %1360 = vmatprep.subr.bf16.mxu1 %v1661_v25 }
  0x23   :  { %1346 = vmatpush1.bf16.msra.mxu0 %v1665_v28  ;;  %1362 = vmatpush1.bf16.msra.mxu1 %v1665_v28 }
  0x24   :  { %1364 = vmatprep.subr.bf16.mxu0 %v1638_v7  ;;  %1380 = vmatprep.subr.bf16.mxu1 %v1638_v7 }
  0x93   :  { %v55_v35 = vpop.permute.xlu0 %54 }
  0x94   :  { %v92_v36 = vmul.f32 %v55_v35, %v1674_v29  ;;  %v119_v37 = vmul.f32 %v1676_v30, %v55_v35  ;;  %v146_v38 = vmul.f32 %v1678_v31, %v55_v35 }
  0x96   :  { %v100_v39 = vadd.f32 %v92_v36, %v1680_v32  ;;  %v127_v40 = vadd.f32 %v119_v37, %v1682_v33  ;;  %v154_v41 = vadd.f32 %v146_v38, %v1684_v34 }
  0x97   :  { %v60_v42 = vpop.permute.xlu0 %59 }
  0x98   :  { %109 = vst.msk [vmem:[#allocation2] sm:$0xff] %vm108_vm0, %v100_v39  ;;  %136 = vst.msk [vmem:[#allocation2 + $0x40] sm:$0xff] %vm108_vm0, %v127_v40  ;;  %v93_v43 = vmul.f32 %v60_v42, %v1674_v29  ;;  %v120_v44 = vmul.f32 %v1676_v30, %v60_v42  ;;  %v147_v45 = vmul.f32 %v1678_v31, %v60_v42 }
  0x99   :  { %163 = vst.msk [vmem:[#allocation2 + $0x80] sm:$0xff] %vm108_vm0, %v154_v41 }
  0x9a   :  { %v101_v46 = vadd.f32 %v93_v43, %v1680_v32  ;;  %v128_v47 = vadd.f32 %v120_v44, %v1682_v33  ;;  %v155_v48 = vadd.f32 %v147_v45, %v1684_v34 }
  0x9b   :  { %v65_v49 = vpop.permute.xlu0 %64 }
  0x9c   :  { %110 = vst.msk [vmem:[#allocation2 + $0x8] sm:$0xff] %vm108_vm0, %v101_v46  ;;  %137 = vst.msk [vmem:[#allocation2 + $0x48] sm:$0xff] %vm108_vm0, %v128_v47  ;;  %v94_v50 = vmul.f32 %v65_v49, %v1674_v29  ;;  %v121_v51 = vmul.f32 %v1676_v30, %v65_v49  ;;  %v148_v52 = vmul.f32 %v1678_v31, %v65_v49 }
  0x9d   :  { %164 = vst.msk [vmem:[#allocation2 + $0x88] sm:$0xff] %vm108_vm0, %v155_v48 }
  0x9e   :  { %v102_v53 = vadd.f32 %v94_v50, %v1680_v32  ;;  %v129_v54 = vadd.f32 %v121_v51, %v1682_v33  ;;  %v156_v55 = vadd.f32 %v148_v52, %v1684_v34 }
  0x9f   :  { %v176_v56 = vld [vmem:[#allocation2] sm:$0xff] }
  0xa0   :  { %111 = vst.msk [vmem:[#allocation2 + $0x10] sm:$0xff] %vm108_vm0, %v102_v53  ;;  %138 = vst.msk [vmem:[#allocation2 + $0x50] sm:$0xff] %vm108_vm0, %v129_v54  ;;  %v1277_v57 = vmul.f32 -1.442695, %v176_v56  ;;  %v183_v58 = vld [vmem:[#allocation2 + $0x40] sm:$0xff] }
  0xa1   :  { %165 = vst.msk [vmem:[#allocation2 + $0x90] sm:$0xff] %vm108_vm0, %v156_v55  ;;  %v1278_v59 = vmul.f32 -1.442695, %v183_v58  ;;  %v190_v3 = vld [vmem:[#allocation2 + $0x80] sm:$0xff] }
  0xa2   :  { %1479 = vpow2.f32 %v1277_v57 }
  0xa3   :  { %1481 = vpow2.f32 %v1278_v59  ;;  %v272_v20 = vld [vmem:[#allocation2 + $0x8] sm:$0xff] }
  0xa4   :  { %v275_v38 = vld [vmem:[#allocation2 + $0x48] sm:$0xff] }
  0xa5   :  { %v278_v43 = vld [vmem:[#allocation2 + $0x88] sm:$0xff] }
  0xa7   :  { %v385_v55 = vld [vmem:[#allocation2 + $0x10] sm:$0xff] }
  0xac   :  { %v1480_v60 = vpop.eup %1479 }
  0xad   :  { %v180_v61 = vadd.f32 1.0, %v1480_v60  ;;  %v1482_v62 = vpop.eup %1481 }
  0xae   :  { %v187_v63 = vadd.f32 1.0, %v1482_v62 }
  0xaf   :  { %1483 = vrcp.f32 %v180_v61  ;;  %v45_v61 = vld [vmem:[%s1870_s0 + $0x18] sm:$0xff] }
  0xb0   :  { %1485 = vrcp.f32 %v187_v63 }
  0xb9   :  { %v1484_v1 = vpop.eup %1483 }
  0xba   :  { %v191_v2 = vmul.f32 %v1484_v1, %v1713_v0  ;;  %v1486_v8 = vpop.eup %1485 }
  0xbb   :  { %v194_v9 = vsub.f32 1.0, %v1486_v8  ;;  %v391_v8 = vld [vmem:[#allocation2 + $0x90] sm:$0xff] }
  0xbc   :  { %v192_v4 = vadd.f32 %v191_v2, %v190_v3  ;;  %v388_v2 = vld [vmem:[#allocation2 + $0x50] sm:$0xff] }
  0xbe   :  { %1487 = vtanh.f32 %v192_v4 }
  0xc8   :  { %v1488_v10 = vpop.eup %1487 }
  0xc9   :  { %v195_v15 = vmul.f32 %v1488_v10, %v194_v9 }
  0xcb   :  { %v196_v16 = vmul.f32 %v1276_v14, %v195_v15 }
  0xcd   :  { %1279 = vmatmul.mubr.msk.f32.vlgmr.msra.gmra.mrb[0].mxu0 %vm108_vm0, %v196_v16 }
  0xce   :  { %1366 = vmatpush1.bf16.msra.mxu0 %v1642_v12  ;;  %490 = vmatprep.mubr.f32.mxu0 %v1597_v11 }
  0xcf   :  { %1368 = vmatprep.subr.bf16.mxu0 %v1644_v13 }
  0xd2   :  { %1370 = vmatpush1.bf16.msra.mxu0 %v1649_v18 }
  0xd3   :  { %1372 = vmatprep.subr.bf16.mxu0 %v1653_v19 }
  0xd6   :  { %1374 = vmatpush1.bf16.msra.mxu0 %v1657_v24 }
  0xd7   :  { %1376 = vmatprep.subr.bf16.mxu0 %v1661_v25 }
  0xda   :  { %1378 = vmatpush1.bf16.msra.mxu0 %v1665_v28 }
  0xdb   :  { %1396 = vmatprep.subr.bf16.mxu0 %v1638_v7 }
 0x1a0   :  { %v266_v17 = vpop.f32.mrb[0].mxu0 }
 0x1a1   :  { %v279_v21 = vadd.f32 %v272_v20, %v266_v17  ;;  %287 = vrot.lane.b32.xlu1 %v266_v17, %s1598_s1  ;;  %v268_v22 = vpop.f32.mrb[1].mxu0 }
 0x1a2   :  { %v302_v35 = vadd.f32 %v268_v22, %v1713_v0 }
 0x1a3   :  { %v1280_v23 = vmul.f32 -1.442695, %v279_v21 }
 0x1a5   :  { %1489 = vpow2.f32 %v1280_v23  ;;  %298 = vrot.lane.b32.xlu1 %v268_v22, %s1598_s1 }
 0x1af   :  { %v1490_v26 = vpop.eup %1489 }
 0x1b0   :  { %v283_v27 = vadd.f32 1.0, %v1490_v26 }
 0x1b2   :  { %1491 = vrcp.f32 %v283_v27 }
 0x1bc   :  { %v1492_v36 = vpop.eup %1491 }
 0x1bd   :  { %v303_v37 = vmul.f32 %v1492_v36, %v302_v35 }
 0x213   :  { %v288_v39 = vpop.permute.xlu1 %287 }
 0x214   :  { %v290_v40 = vadd.f32 %v288_v39, %v275_v38 }
 0x216   :  { %v1281_v41 = vmul.f32 -1.442695, %v290_v40 }
 0x217   :  { %v299_v42 = vpop.permute.xlu1 %298 }
 0x218   :  { %1493 = vpow2.f32 %v1281_v41  ;;  %v301_v44 = vadd.f32 %v299_v42, %v278_v43 }
 0x21a   :  { %v304_v47 = vadd.f32 %v303_v37, %v301_v44  ;;  %v46_v44 = vld [vmem:[%s1870_s0 + $0x20] sm:$0xff] }
 0x222   :  { %v1494_v45 = vpop.eup %1493 }
 0x223   :  { %v294_v46 = vadd.f32 1.0, %v1494_v45 }
 0x225   :  { %1495 = vrcp.f32 %v294_v46 }
 0x226   :  { %1497 = vtanh.f32 %v304_v47 }
 0x22f   :  { %v1496_v48 = vpop.eup %1495 }
 0x230   :  { %v306_v49 = vsub.f32 1.0, %v1496_v48  ;;  %v1498_v50 = vpop.eup %1497  ;;  %v308_v52 = vmul.f32 %v1496_v48, %v196_v16 }
 0x232   :  { %v307_v51 = vmul.f32 %v1498_v50, %v306_v49 }
 0x234   :  { %v309_v53 = vadd.f32 %v308_v52, %v307_v51 }
 0x236   :  { %1282 = vmatmul.mubr.msk.f32.vlgmr.msra.gmra.mrb[0].mxu1 %vm108_vm0, %v309_v53 }
 0x237   :  { %1382 = vmatpush1.bf16.msra.mxu1 %v1642_v12  ;;  %603 = vmatprep.mubr.f32.mxu1 %v1597_v11 }
 0x238   :  { %1384 = vmatprep.subr.bf16.mxu1 %v1644_v13 }
 0x23b   :  { %1386 = vmatpush1.bf16.msra.mxu1 %v1649_v18 }
 0x23c   :  { %1388 = vmatprep.subr.bf16.mxu1 %v1653_v19 }
 0x23f   :  { %1390 = vmatpush1.bf16.msra.mxu1 %v1657_v24 }
 0x240   :  { %1392 = vmatprep.subr.bf16.mxu1 %v1661_v25 }
 0x243   :  { %1394 = vmatpush1.bf16.msra.mxu1 %v1665_v28 }
 0x244   :  { %1412 = vmatprep.subr.bf16.mxu1 %v1638_v7 }
 0x309   :  { %v379_v54 = vpop.f32.mrb[0].mxu1 }
 0x30a   :  { %v392_v56 = vadd.f32 %v385_v55, %v379_v54  ;;  %400 = vrot.lane.b32.xlu1 %v379_v54, %s1598_s1  ;;  %v381_v57 = vpop.f32.mrb[1].mxu1 }
 0x30b   :  { %411 = vrot.lane.b32.xlu0 %v381_v57, %s1598_s1  ;;  %v415_v62 = vadd.f32 %v381_v57, %v1713_v0 }
 0x30c   :  { %v1283_v58 = vmul.f32 -1.442695, %v392_v56 }
 0x30e   :  { %1499 = vpow2.f32 %v1283_v58  ;;  %69 = vperm.xlu1 %1478, %v45_v61  }
 0x318   :  { %v1500_v59 = vpop.eup %1499 }
 0x319   :  { %v396_v60 = vadd.f32 1.0, %v1500_v59 }
 0x31b   :  { %1501 = vrcp.f32 %v396_v60 }
 0x325   :  { %v1502_v63 = vpop.eup %1501 }
 0x326   :  { %v416_v1 = vmul.f32 %v1502_v63, %v415_v62 }
 0x37c   :  { %v401_v3 = vpop.permute.xlu1 %400 }
 0x37d   :  { %v403_v4 = vadd.f32 %v401_v3, %v388_v2  ;;  %v412_v6 = vpop.permute.xlu0 %411 }
 0x37e   :  { %v414_v9 = vadd.f32 %v412_v6, %v391_v8 }
 0x37f   :  { %v1284_v5 = vmul.f32 -1.442695, %v403_v4 }
 0x380   :  { %v417_v15 = vadd.f32 %v416_v1, %v414_v9 }
 0x381   :  { %1503 = vpow2.f32 %v1284_v5 }
 0x38b   :  { %v1504_v10 = vpop.eup %1503 }
 0x38c   :  { %v407_v14 = vadd.f32 1.0, %v1504_v10 }
 0x38d   :  { %v70_v26 = vpop.permute.xlu1 %69 }
 0x38e   :  { %1505 = vrcp.f32 %v407_v14  ;;  %v95_v27 = vmul.f32 %v70_v26, %v1674_v29  ;;  %v122_v35 = vmul.f32 %v1676_v30, %v70_v26  ;;  %v149_v36 = vmul.f32 %v1678_v31, %v70_v26 }
 0x38f   :  { %1507 = vtanh.f32 %v417_v15 }
 0x390   :  { %v103_v37 = vadd.f32 %v95_v27, %v1680_v32  ;;  %v130_v38 = vadd.f32 %v122_v35, %v1682_v33  ;;  %v157_v39 = vadd.f32 %v149_v36, %v1684_v34 }
 0x392   :  { %112 = vst.msk [vmem:[#allocation2 + $0x18] sm:$0xff] %vm108_vm0, %v103_v37  ;;  %139 = vst.msk [vmem:[#allocation2 + $0x58] sm:$0xff] %vm108_vm0, %v130_v38 }
 0x393   :  { %166 = vst.msk [vmem:[#allocation2 + $0x98] sm:$0xff] %vm108_vm0, %v157_v39 }
 0x398   :  { %v1506_v16 = vpop.eup %1505 }
 0x399   :  { %v419_v17 = vsub.f32 1.0, %v1506_v16  ;;  %v1508_v20 = vpop.eup %1507  ;;  %v421_v22 = vmul.f32 %v1506_v16, %v309_v53  ;;  %v498_v40 = vld [vmem:[#allocation2 + $0x18] sm:$0xff] }
 0x39a   :  { %v501_v51 = vld [vmem:[#allocation2 + $0x58] sm:$0xff] }
 0x39b   :  { %v420_v21 = vmul.f32 %v1508_v20, %v419_v17  ;;  %v504_v56 = vld [vmem:[#allocation2 + $0x98] sm:$0xff] }
 0x39d   :  { %v1746_v23 = vadd.f32 %v421_v22, %v420_v21  ;;  %v47_v21 = vld [vmem:[%s1870_s0 + $0x28] sm:$0xff] }
 0x39f   :  { %1285 = vmatmul.mubr.msk.f32.vlgmr.msra.gmra.mrb[2].mxu0 %vm108_vm0, %v1746_v23 }
 0x3a0   :  { %1398 = vmatpush1.bf16.msra.mxu0 %v1642_v12  ;;  %716 = vmatprep.mubr.f32.mxu0 %v1597_v11 }
 0x3a1   :  { %1400 = vmatprep.subr.bf16.mxu0 %v1644_v13 }
 0x3a4   :  { %1402 = vmatpush1.bf16.msra.mxu0 %v1649_v18 }
 0x3a5   :  { %1404 = vmatprep.subr.bf16.mxu0 %v1653_v19 }
 0x3a8   :  { %1406 = vmatpush1.bf16.msra.mxu0 %v1657_v24 }
 0x3a9   :  { %1408 = vmatprep.subr.bf16.mxu0 %v1661_v25 }
 0x3ac   :  { %1410 = vmatpush1.bf16.msra.mxu0 %v1665_v28 }
 0x3ad   :  { %1428 = vmatprep.subr.bf16.mxu0 %v1638_v7 }
 0x472   :  { %v492_v41 = vpop.f32.mrb[2].mxu0 }
 0x473   :  { %v505_v42 = vadd.f32 %v498_v40, %v492_v41  ;;  %513 = vrot.lane.b32.xlu0 %v492_v41, %s1598_s1  ;;  %v494_v43 = vpop.f32.mrb[3].mxu0 }
 0x474   :  { %524 = vrot.lane.b32.xlu1 %v494_v43, %s1598_s1  ;;  %v528_v48 = vadd.f32 %v494_v43, %v1713_v0 }
 0x475   :  { %v1286_v45 = vmul.f32 -1.442695, %v505_v42 }
 0x477   :  { %1509 = vpow2.f32 %v1286_v45  ;;  %74 = vperm.xlu0 %1477, %v46_v44  }
 0x481   :  { %v1510_v46 = vpop.eup %1509 }
 0x482   :  { %v509_v47 = vadd.f32 1.0, %v1510_v46 }
 0x484   :  { %1511 = vrcp.f32 %v509_v47 }
 0x48e   :  { %v1512_v49 = vpop.eup %1511 }
 0x48f   :  { %v529_v50 = vmul.f32 %v1512_v49, %v528_v48 }
 0x4e5   :  { %v514_v52 = vpop.permute.xlu0 %513 }
 0x4e6   :  { %v516_v53 = vadd.f32 %v514_v52, %v501_v51  ;;  %v525_v55 = vpop.permute.xlu1 %524 }
 0x4e7   :  { %v527_v57 = vadd.f32 %v525_v55, %v504_v56 }
 0x4e8   :  { %v1287_v54 = vmul.f32 -1.442695, %v516_v53 }
 0x4e9   :  { %v530_v60 = vadd.f32 %v529_v50, %v527_v57 }
 0x4ea   :  { %1513 = vpow2.f32 %v1287_v54 }
 0x4f4   :  { %v1514_v58 = vpop.eup %1513 }
 0x4f5   :  { %v520_v59 = vadd.f32 1.0, %v1514_v58 }
 0x4f6   :  { %v75_v61 = vpop.permute.xlu0 %74 }
 0x4f7   :  { %1515 = vrcp.f32 %v520_v59  ;;  %v96_v62 = vmul.f32 %v75_v61, %v1674_v29  ;;  %v123_v63 = vmul.f32 %v1676_v30, %v75_v61  ;;  %v150_v1 = vmul.f32 %v1678_v31, %v75_v61 }
 0x4f8   :  { %1517 = vtanh.f32 %v530_v60 }
 0x4f9   :  { %v104_v2 = vadd.f32 %v96_v62, %v1680_v32  ;;  %v131_v3 = vadd.f32 %v123_v63, %v1682_v33  ;;  %v158_v4 = vadd.f32 %v150_v1, %v1684_v34  ;;  %v48_v63 = vld [vmem:[%s1870_s0 + $0x30] sm:$0xff] }
 0x4fb   :  { %113 = vst.msk [vmem:[#allocation2 + $0x20] sm:$0xff] %vm108_vm0, %v104_v2  ;;  %140 = vst.msk [vmem:[#allocation2 + $0x60] sm:$0xff] %vm108_vm0, %v131_v3 }
 0x4fc   :  { %167 = vst.msk [vmem:[#allocation2 + $0xa0] sm:$0xff] %vm108_vm0, %v158_v4 }
 0x501   :  { %v1516_v5 = vpop.eup %1515 }
 0x502   :  { %v532_v6 = vsub.f32 1.0, %v1516_v5  ;;  %v1518_v8 = vpop.eup %1517  ;;  %v534_v10 = vmul.f32 %v1516_v5, %v1746_v23  ;;  %v611_v16 = vld [vmem:[#allocation2 + $0x20] sm:$0xff] }
 0x503   :  { %v614_v36 = vld [vmem:[#allocation2 + $0x60] sm:$0xff] }
 0x504   :  { %v533_v9 = vmul.f32 %v1518_v8, %v532_v6  ;;  %v617_v41 = vld [vmem:[#allocation2 + $0xa0] sm:$0xff] }
 0x506   :  { %v535_v14 = vadd.f32 %v534_v10, %v533_v9 }
 0x508   :  { %1288 = vmatmul.mubr.msk.f32.vlgmr.msra.gmra.mrb[2].mxu1 %vm108_vm0, %v535_v14 }
 0x509   :  { %1414 = vmatpush1.bf16.msra.mxu1 %v1642_v12  ;;  %829 = vmatprep.mubr.f32.mxu1 %v1597_v11 }
 0x50a   :  { %1416 = vmatprep.subr.bf16.mxu1 %v1644_v13 }
 0x50d   :  { %1418 = vmatpush1.bf16.msra.mxu1 %v1649_v18 }
 0x50e   :  { %1420 = vmatprep.subr.bf16.mxu1 %v1653_v19 }
 0x511   :  { %1422 = vmatpush1.bf16.msra.mxu1 %v1657_v24 }
 0x512   :  { %1424 = vmatprep.subr.bf16.mxu1 %v1661_v25 }
 0x515   :  { %1426 = vmatpush1.bf16.msra.mxu1 %v1665_v28 }
 0x516   :  { %1444 = vmatprep.subr.bf16.mxu1 %v1638_v7 }
 0x5db   :  { %v605_v15 = vpop.f32.mrb[2].mxu1 }
 0x5dc   :  { %v618_v17 = vadd.f32 %v611_v16, %v605_v15  ;;  %626 = vrot.lane.b32.xlu1 %v605_v15, %s1598_s1  ;;  %v607_v20 = vpop.f32.mrb[3].mxu1 }
 0x5dd   :  { %637 = vrot.lane.b32.xlu0 %v607_v20, %s1598_s1  ;;  %v641_v7 = vadd.f32 %v607_v20, %v1713_v0 }
 0x5de   :  { %v1289_v22 = vmul.f32 -1.442695, %v618_v17 }
 0x5e0   :  { %1519 = vpow2.f32 %v1289_v22  ;;  %79 = vperm.xlu1 %1478, %v47_v21  }
 0x5ea   :  { %v1520_v23 = vpop.eup %1519 }
 0x5eb   :  { %v622_v26 = vadd.f32 1.0, %v1520_v23 }
 0x5ed   :  { %1521 = vrcp.f32 %v622_v26 }
 0x5f7   :  { %v1522_v27 = vpop.eup %1521 }
 0x5f8   :  { %v642_v35 = vmul.f32 %v1522_v27, %v641_v7 }
 0x64e   :  { %v627_v37 = vpop.permute.xlu1 %626 }
 0x64f   :  { %v629_v38 = vadd.f32 %v627_v37, %v614_v36  ;;  %v638_v40 = vpop.permute.xlu0 %637 }
 0x650   :  { %v640_v42 = vadd.f32 %v638_v40, %v617_v41 }
 0x651   :  { %v1290_v39 = vmul.f32 -1.442695, %v629_v38 }
 0x652   :  { %v643_v45 = vadd.f32 %v642_v35, %v640_v42 }
 0x653   :  { %1523 = vpow2.f32 %v1290_v39 }
 0x65d   :  { %v1524_v43 = vpop.eup %1523 }
 0x65e   :  { %v633_v44 = vadd.f32 1.0, %v1524_v43 }
 0x65f   :  { %v80_v46 = vpop.permute.xlu1 %79 }
 0x660   :  { %1525 = vrcp.f32 %v633_v44  ;;  %v97_v47 = vmul.f32 %v80_v46, %v1674_v29  ;;  %v124_v48 = vmul.f32 %v1676_v30, %v80_v46  ;;  %v151_v49 = vmul.f32 %v1678_v31, %v80_v46 }
 0x661   :  { %1527 = vtanh.f32 %v643_v45 }
 0x662   :  { %v105_v50 = vadd.f32 %v97_v47, %v1680_v32  ;;  %v132_v51 = vadd.f32 %v124_v48, %v1682_v33  ;;  %v159_v52 = vadd.f32 %v151_v49, %v1684_v34 }
 0x664   :  { %114 = vst.msk [vmem:[#allocation2 + $0x28] sm:$0xff] %vm108_vm0, %v105_v50  ;;  %141 = vst.msk [vmem:[#allocation2 + $0x68] sm:$0xff] %vm108_vm0, %v132_v51 }
 0x665   :  { %168 = vst.msk [vmem:[#allocation2 + $0xa8] sm:$0xff] %vm108_vm0, %v159_v52 }
 0x66a   :  { %v1526_v53 = vpop.eup %1525 }
 0x66b   :  { %v645_v54 = vsub.f32 1.0, %v1526_v53  ;;  %v1528_v55 = vpop.eup %1527  ;;  %v647_v57 = vmul.f32 %v1526_v53, %v535_v14  ;;  %v724_v60 = vld [vmem:[#allocation2 + $0x28] sm:$0xff] }
 0x66c   :  { %v727_v8 = vld [vmem:[#allocation2 + $0x68] sm:$0xff] }
 0x66d   :  { %v646_v56 = vmul.f32 %v1528_v55, %v645_v54  ;;  %v730_v16 = vld [vmem:[#allocation2 + $0xa8] sm:$0xff] }
 0x66f   :  { %v648_v58 = vadd.f32 %v647_v57, %v646_v56 }
 0x671   :  { %1291 = vmatmul.mubr.msk.f32.vlgmr.msra.gmra.mrb[4].mxu0 %vm108_vm0, %v648_v58 }
 0x672   :  { %1430 = vmatpush1.bf16.msra.mxu0 %v1642_v12  ;;  %942 = vmatprep.mubr.f32.mxu0 %v1597_v11 }
 0x673   :  { %1432 = vmatprep.subr.bf16.mxu0 %v1644_v13 }
 0x676   :  { %1434 = vmatpush1.bf16.msra.mxu0 %v1649_v18 }
 0x677   :  { %1436 = vmatprep.subr.bf16.mxu0 %v1653_v19 }
 0x67a   :  { %1438 = vmatpush1.bf16.msra.mxu0 %v1657_v24 }
 0x67b   :  { %1440 = vmatprep.subr.bf16.mxu0 %v1661_v25 }
 0x67e   :  { %1442 = vmatpush1.bf16.msra.mxu0 %v1665_v28 }
 0x744   :  { %v718_v59 = vpop.f32.mrb[4].mxu0 }
 0x745   :  { %v731_v61 = vadd.f32 %v724_v60, %v718_v59  ;;  %739 = vrot.lane.b32.xlu0 %v718_v59, %s1598_s1  ;;  %v720_v62 = vpop.f32.mrb[5].mxu0 }
 0x746   :  { %750 = vrot.lane.b32.xlu1 %v720_v62, %s1598_s1  ;;  %v754_v4 = vadd.f32 %v720_v62, %v1713_v0 }
 0x747   :  { %v1292_v1 = vmul.f32 -1.442695, %v731_v61 }
 0x749   :  { %1529 = vpow2.f32 %v1292_v1  ;;  %84 = vperm.xlu0 %1477, %v48_v63  }
 0x753   :  { %v1530_v2 = vpop.eup %1529 }
 0x754   :  { %v735_v3 = vadd.f32 1.0, %v1530_v2 }
 0x756   :  { %1531 = vrcp.f32 %v735_v3 }
 0x760   :  { %v1532_v5 = vpop.eup %1531 }
 0x761   :  { %v755_v6 = vmul.f32 %v1532_v5, %v754_v4 }
 0x7b7   :  { %v740_v9 = vpop.permute.xlu0 %739 }
 0x7b8   :  { %v742_v10 = vadd.f32 %v740_v9, %v727_v8  ;;  %v751_v15 = vpop.permute.xlu1 %750 }
 0x7b9   :  { %v753_v17 = vadd.f32 %v751_v15, %v730_v16 }
 0x7ba   :  { %v1293_v14 = vmul.f32 -1.442695, %v742_v10 }
 0x7bb   :  { %v756_v22 = vadd.f32 %v755_v6, %v753_v17 }
 0x7bc   :  { %1533 = vpow2.f32 %v1293_v14 }
 0x7c6   :  { %v1534_v20 = vpop.eup %1533 }
 0x7c7   :  { %v746_v21 = vadd.f32 1.0, %v1534_v20 }
 0x7c8   :  { %v85_v23 = vpop.permute.xlu0 %84 }
 0x7c9   :  { %1535 = vrcp.f32 %v746_v21  ;;  %v98_v26 = vmul.f32 %v85_v23, %v1674_v29  ;;  %v125_v7 = vmul.f32 %v1676_v30, %v85_v23  ;;  %v152_v27 = vmul.f32 %v1678_v31, %v85_v23 }
 0x7ca   :  { %1537 = vtanh.f32 %v756_v22 }
 0x7cb   :  { %v106_v35 = vadd.f32 %v98_v26, %v1680_v32  ;;  %v133_v36 = vadd.f32 %v125_v7, %v1682_v33  ;;  %v160_v37 = vadd.f32 %v152_v27, %v1684_v34 }
 0x7cd   :  { %115 = vst.msk [vmem:[#allocation2 + $0x30] sm:$0xff] %vm108_vm0, %v106_v35  ;;  %142 = vst.msk [vmem:[#allocation2 + $0x70] sm:$0xff] %vm108_vm0, %v133_v36 }
 0x7ce   :  { %169 = vst.msk [vmem:[#allocation2 + $0xb0] sm:$0xff] %vm108_vm0, %v160_v37 }
 0x7d3   :  { %v1536_v38 = vpop.eup %1535 }
 0x7d4   :  { %v758_v39 = vsub.f32 1.0, %v1536_v38  ;;  %v1538_v40 = vpop.eup %1537  ;;  %v760_v42 = vmul.f32 %v1536_v38, %v648_v58  ;;  %v837_v45 = vld [vmem:[#allocation2 + $0x30] sm:$0xff] }
 0x7d5   :  { %v840_v48 = vld [vmem:[#allocation2 + $0x70] sm:$0xff] }
 0x7d6   :  { %v759_v41 = vmul.f32 %v1538_v40, %v758_v39  ;;  %v843_v53 = vld [vmem:[#allocation2 + $0xb0] sm:$0xff] }
 0x7d8   :  { %v761_v43 = vadd.f32 %v760_v42, %v759_v41 }
 0x7da   :  { %1294 = vmatmul.mubr.msk.f32.vlgmr.msra.gmra.mrb[4].mxu1 %vm108_vm0, %v761_v43 }
 0x7db   :  { %1446 = vmatpush1.bf16.msra.mxu1 %v1642_v12  ;;  %1055 = vmatprep.mubr.f32.mxu1 %v1597_v11 }
 0x7dc   :  { %1448 = vmatprep.subr.bf16.mxu1 %v1644_v13  ;;  %v49_v13 = vld [vmem:[%s1870_s0 + $0x38] sm:$0xff]  ;;  %s1601_s0 = smov 96  }
 0x7df   :  { %1450 = vmatpush1.bf16.msra.mxu1 %v1649_v18 }
 0x7e0   :  { %1452 = vmatprep.subr.bf16.mxu1 %v1653_v19 }
 0x7e3   :  { %1454 = vmatpush1.bf16.msra.mxu1 %v1657_v24 }
 0x7e4   :  { %1456 = vmatprep.subr.bf16.mxu1 %v1661_v25 }
 0x7e7   :  { %1458 = vmatpush1.bf16.msra.mxu1 %v1665_v28 }
 0x8ad   :  { %v831_v44 = vpop.f32.mrb[4].mxu1 }
 0x8ae   :  { %v844_v46 = vadd.f32 %v837_v45, %v831_v44  ;;  %852 = vrot.lane.b32.xlu1 %v831_v44, %s1598_s1  ;;  %v833_v12 = vpop.f32.mrb[5].mxu1 }
 0x8af   :  { %863 = vrot.lane.b32.xlu0 %v833_v12, %s1598_s1  ;;  %v867_v25 = vadd.f32 %v833_v12, %v1713_v0 }
 0x8b0   :  { %v1295_v18 = vmul.f32 -1.442695, %v844_v46 }
 0x8b2   :  { %1539 = vpow2.f32 %v1295_v18  ;;  %89 = vperm.xlu1 %1478, %v49_v13   ;;  %v1096_v13 = vld [vmem:[#allocation3 + $0x90] sm:$0xff]  ;;  %v1097_v18 = vld [vmem:[#allocation3 + $0xa0] sm:$0xff] }
 0x8bc   :  { %v1540_v19 = vpop.eup %1539 }
 0x8bd   :  { %v848_v24 = vadd.f32 1.0, %v1540_v19  ;;  %v1098_v19 = vld [vmem:[#allocation3 + $0xb0] sm:$0xff] }
 0x8bf   :  { %1541 = vrcp.f32 %v848_v24  ;;  %v1599_v24 = vmov 0.0|0.0  }
 0x8c0   :  { %1459 = vmatprep.subr.bf16.mxu0 %v1599_v24  ;;  %1465 = vmatprep.subr.bf16.mxu1 %v1599_v24 }
 0x8c9   :  { %v1542_v28 = vpop.eup %1541 }
 0x8ca   :  { %v868_v47 = vmul.f32 %v1542_v28, %v867_v25  ;;  %v1460_v25 = vpack.c.bf16 %v1097_v18, %v1096_v13  ;;  %v1099_v28 = vld [vmem:[#allocation3 + $0xc0] sm:$0xff] }
 0x920   :  { %v853_v49 = vpop.permute.xlu1 %852 }
 0x921   :  { %v855_v50 = vadd.f32 %v853_v49, %v840_v48  ;;  %v864_v52 = vpop.permute.xlu0 %863 }
 0x922   :  { %v866_v54 = vadd.f32 %v864_v52, %v843_v53 }
 0x923   :  { %v1296_v51 = vmul.f32 -1.442695, %v855_v50 }
 0x924   :  { %v869_v57 = vadd.f32 %v868_v47, %v866_v54  ;;  %v1463_v47 = vpack.c.bf16 %v1099_v28, %v1098_v19 }
 0x925   :  { %1543 = vpow2.f32 %v1296_v51 }
 0x92f   :  { %v1544_v55 = vpop.eup %1543 }
 0x930   :  { %v859_v56 = vadd.f32 1.0, %v1544_v55 }
 0x931   :  { %v90_v58 = vpop.permute.xlu1 %89 }
 0x932   :  { %1545 = vrcp.f32 %v859_v56  ;;  %v99_v59 = vmul.f32 %v90_v58, %v1674_v29  ;;  %v126_v60 = vmul.f32 %v1676_v30, %v90_v58  ;;  %v153_v61 = vmul.f32 %v1678_v31, %v90_v58 }
 0x933   :  { %1547 = vtanh.f32 %v869_v57 }
 0x934   :  { %v107_v62 = vadd.f32 %v99_v59, %v1680_v32  ;;  %v134_v63 = vadd.f32 %v126_v60, %v1682_v33  ;;  %v161_v1 = vadd.f32 %v153_v61, %v1684_v34 }
 0x936   :  { %116 = vst.msk [vmem:[#allocation2 + $0x38] sm:$0xff] %vm108_vm0, %v107_v62  ;;  %143 = vst.msk [vmem:[#allocation2 + $0x78] sm:$0xff] %vm108_vm0, %v134_v63 }
 0x937   :  { %170 = vst.msk [vmem:[#allocation2 + $0xb8] sm:$0xff] %vm108_vm0, %v161_v1  ;;  %v1101_v1 = vld [vmem:[#allocation3 + $0xd0] sm:$0xff] }
 0x93c   :  { %v1546_v2 = vpop.eup %1545 }
 0x93d   :  { %v871_v3 = vsub.f32 1.0, %v1546_v2  ;;  %v1548_v29 = vpop.eup %1547  ;;  %v873_v30 = vmul.f32 %v1546_v2, %v761_v43  ;;  %v950_v32 = vld [vmem:[#allocation2 + $0x38] sm:$0xff]  ;;  %v1102_v2 = vld [vmem:[#allocation3 + $0xe0] sm:$0xff] }
 0x93e   :  { %v953_v16 = vld [vmem:[#allocation2 + $0x78] sm:$0xff] }
 0x93f   :  { %v872_v4 = vmul.f32 %v1548_v29, %v871_v3  ;;  %v956_v23 = vld [vmem:[#allocation2 + $0xb8] sm:$0xff]  ;;  %v1466_v3 = vpack.c.bf16 %v1102_v2, %v1101_v1  ;;  %v1100_v29 = vld [vmem:[#allocation3 + $0x87] ss:$0 sm:$0xff] }
 0x941   :  { %v874_v5 = vadd.f32 %v873_v30, %v872_v4 }
 0x943   :  { %1297 = vmatmul.mubr.msk.f32.vlgmr.msra.gmra.mrb[6].mxu0 %vm108_vm0, %v874_v5 }
 0x944   :  { %1321 = vmatprep.mubr.msk.f32.mxu0 %vm1600_vm2, %v1597_v11  ;;  %1461 = vmatpush3.bf16.msra.mxu0 %v1460_v25 }
 0x945   :  { %1462 = vmatprep.subr.bf16.mxu0 %v1599_v24 }
 0x948   :  { %1464 = vmatpush3.bf16.msra.mxu0 %v1463_v47 }
 0xa16   :  { %v944_v31 = vpop.f32.mrb[6].mxu0 }
 0xa17   :  { %v957_v6 = vadd.f32 %v950_v32, %v944_v31  ;;  %965 = vrot.lane.b32.xlu0 %v944_v31, %s1598_s1  ;;  %v946_v33 = vpop.f32.mrb[7].mxu0 }
 0xa18   :  { %976 = vrot.lane.b32.xlu1 %v946_v33, %s1598_s1  ;;  %v980_v10 = vadd.f32 %v946_v33, %v1713_v0 }
 0xa19   :  { %v1298_v34 = vmul.f32 -1.442695, %v957_v6 }
 0xa1b   :  { %1549 = vpow2.f32 %v1298_v34 }
 0xa25   :  { %v1550_v8 = vpop.eup %1549 }
 0xa26   :  { %v961_v9 = vadd.f32 1.0, %v1550_v8 }
 0xa28   :  { %1551 = vrcp.f32 %v961_v9 }
 0xa32   :  { %v1552_v14 = vpop.eup %1551 }
 0xa33   :  { %v981_v15 = vmul.f32 %v1552_v14, %v980_v10 }
 0xa89   :  { %v966_v17 = vpop.permute.xlu0 %965 }
 0xa8a   :  { %v968_v20 = vadd.f32 %v966_v17, %v953_v16  ;;  %v977_v22 = vpop.permute.xlu1 %976 }
 0xa8b   :  { %v979_v26 = vadd.f32 %v977_v22, %v956_v23 }
 0xa8c   :  { %v1299_v21 = vmul.f32 -1.442695, %v968_v20 }
 0xa8d   :  { %v982_v35 = vadd.f32 %v981_v15, %v979_v26 }
 0xa8e   :  { %1553 = vpow2.f32 %v1299_v21 }
 0xa98   :  { %v1554_v7 = vpop.eup %1553 }
 0xa99   :  { %v972_v27 = vadd.f32 1.0, %v1554_v7 }
 0xa9b   :  { %1555 = vrcp.f32 %v972_v27 }
 0xa9c   :  { %1557 = vtanh.f32 %v982_v35 }
 0xaa5   :  { %v1556_v36 = vpop.eup %1555 }
 0xaa6   :  { %v984_v37 = vsub.f32 1.0, %v1556_v36  ;;  %v1558_v38 = vpop.eup %1557  ;;  %v986_v40 = vmul.f32 %v1556_v36, %v874_v5 }
 0xaa8   :  { %v985_v39 = vmul.f32 %v1558_v38, %v984_v37 }
 0xaaa   :  { %v987_v41 = vadd.f32 %v986_v40, %v985_v39 }
 0xaac   :  { %1300 = vmatmul.mubr.msk.f32.vlgmr.msra.gmra.mrb[6].mxu1 %vm108_vm0, %v987_v41 }
 0xaad   :  { %1328 = vmatprep.mubr.msk.f32.mxu1 %vm1600_vm2, %v1597_v11  ;;  %1467 = vmatpush3.bf16.msra.mxu1 %v1466_v3 }
 0xb7f   :  { %v1057_v42 = vpop.f32.mrb[6].mxu1 }
 0xb80   :  { %v1065_v43 = vadd.f32 %v1057_v42, %v950_v32  ;;  %1073 = vrot.lane.b32.xlu0 %v1057_v42, %s1598_s1  ;;  %v1059_v44 = vpop.f32.mrb[7].mxu1  ;;  %v1103_v32 = vld [vmem:[#allocation3 + $0xf0] ss:$0 sm:$0xff] }
 0xb81   :  { %1084 = vrot.lane.b32.xlu1 %v1059_v44, %s1598_s1  ;;  %v1088_v48 = vadd.f32 %v1059_v44, %v1713_v0 }
 0xb82   :  { %v1301_v45 = vmul.f32 -1.442695, %v1065_v43 }
 0xb84   :  { %1559 = vpow2.f32 %v1301_v45 }
 0xb8e   :  { %v1560_v46 = vpop.eup %1559 }
 0xb8f   :  { %v1069_v12 = vadd.f32 1.0, %v1560_v46 }
 0xb91   :  { %1561 = vrcp.f32 %v1069_v12 }
 0xb9b   :  { %v1562_v49 = vpop.eup %1561 }
 0xb9c   :  { %v1089_v50 = vmul.f32 %v1562_v49, %v1088_v48 }
 0xbf2   :  { %v1074_v51 = vpop.permute.xlu0 %1073 }
 0xbf3   :  { %v1076_v52 = vadd.f32 %v1074_v51, %v953_v16  ;;  %v1085_v54 = vpop.permute.xlu1 %1084 }
 0xbf4   :  { %v1087_v55 = vadd.f32 %v1085_v54, %v956_v23 }
 0xbf5   :  { %v1302_v53 = vmul.f32 -1.442695, %v1076_v52 }
 0xbf6   :  { %v1090_v58 = vadd.f32 %v1089_v50, %v1087_v55 }
 0xbf7   :  { %1563 = vpow2.f32 %v1302_v53 }
 0xc01   :  { %v1564_v56 = vpop.eup %1563 }
 0xc02   :  { %v1080_v57 = vadd.f32 1.0, %v1564_v56 }
 0xc04   :  { %1565 = vrcp.f32 %v1080_v57 }
 0xc05   :  { %1567 = vtanh.f32 %v1090_v58 }
 0xc0e   :  { %v1566_v11 = vpop.eup %1565 }
 0xc0f   :  { %v1092_v59 = vsub.f32 1.0, %v1566_v11  ;;  %v1568_v60 = vpop.eup %1567  ;;  %v1094_v62 = vmul.f32 %v1566_v11, %v987_v41 }
 0xc11   :  { %v1093_v61 = vmul.f32 %v1568_v60, %v1092_v59 }
 0xc13   :  { %v1095_v0 = vadd.f32 %v1094_v62, %v1093_v61 }
 0xc15   :  { %1105 = vrot.lane.b32.xlu0 %v1095_v0, %s1601_s0 }
 0xc87   :  { %v1106_v63 = vpop.permute.xlu0 %1105 }
 0xc88   :  { %1322 = vmatmul.mubr.msk.f32.vlgmr.msra.gmra.mrb[8].mxu0 %vm1107_vm3, %v1106_v63 }
 0xd5b   :  { %v1176_v4 = vpop.f32.mrb[8].mxu0 }
 0xd5c   :  { %v1177_v30 = vadd.f32 %v1176_v4, %v1100_v29  ;;  %v1323_v5 = vpop.f32.mrb[9].mxu0 }
 0xd5e   :  { %v1180_v31 = vmax.f32 %v1177_v30, 0.0 }
 0xd60   :  { %1329 = vmatmul.mubr.msk.f32.vlgmr.msra.gmra.mrb[8].mxu1 %vm1181_vm4, %v1180_v31 }
 0xe33   :  { %v1251_v6 = vpop.f32.mrb[8].mxu1 }
 0xe34   :  { %v1252_v33 = vadd.f32 %v1251_v6, %v1103_v32  ;;  %v1330_v34 = vpop.f32.mrb[9].mxu1 }
 0xe36   :  { %1256 = vst.msk [vmem:[%s1872_s2] sm:$0xff] %vm1255_vm5, %v1252_v33 }
 0xe37   :  { %1261 = vsyncpa [#allocation4], 1 }

</bundles_post_ra>
